<compile_context>
chip_gen: v5e
topology: v5e:2x2
jax: 0.10.0
libtpu: 0.0.40
codegen_flags: <defaults>
</compile_context>

<pallas_src>
import functools

import jax
import jax.numpy as jnp
from jax.experimental import pallas as pl
from jax.experimental.pallas import tpu as pltpu

NEG_INF = -1e30
BN_EPS = 1e-5          # torch BatchNorm1d default eps
LEAKY_SLOPE = 0.01     # torch F.leaky_relu default negative_slope


def _leaky_relu(x):
    return jnp.where(x > 0, x, LEAKY_SLOPE * x)


# --------------------------- kernel 1: per-row-tile RGAT ---------------------------
def rgat_rows_kernel(ft_dst_ref, ft_src_ref, rel_ref, norm_ref, wf_ref, wb_ref,
                     out_ref, stats_ref, *, R, Dout, G):
    """One (dst-row tile, head group) step.

    ft_dst_ref : (TM, Din)  bf16   features of this tile's destination rows
    ft_src_ref : (N, Din)   bf16   full node features (shared across the grid)
    rel_ref    : (TM, N)    int8   relation id of edge (src j -> dst i), -1 = no edge
    norm_ref   : (TM, 1)    f32    DGL 'norm' node data (1 / in-degree)
    wf_ref     : (G, Din, (R+1)*Dout + R) bf16  fused [w_loop | w_rel_* | W_r@a_l]
    wb_ref     : (G, 1, Dout) f32  bias (zeros-initialized in the module)
    out_ref    : (TM, G*Dout) f32  pre-BatchNorm node repr ('cat' column layout)
    stats_ref  : (1, G, 2, Dout) f32  per-tile per-head (sum, sum of squares)
    """
    ft_dst = ft_dst_ref[...]                       # (TM, Din) bf16
    ft_src = ft_src_ref[...]                       # (N, Din)  bf16
    # int8 in HBM/VMEM (4x DMA saving); widen once in-kernel so all masks come from
    # native-layout i32 compares.
    rel = rel_ref[...].astype(jnp.int32)           # (TM, N)
    norm = norm_ref[...]                           # (TM, 1)
    edge = rel >= 0
    masks = [rel == r for r in range(R)]           # computed ONCE, reused for logits & p_r

    stats_list = []
    for gg in range(G):
        wf = wf_ref[gg]                            # (Din, Dtot) bf16
        wb = wb_ref[gg]                            # (1, Dout)   f32

        # single fused matmul for [loop_msg | x_all | att] (f32 accumulate on the MXU)
        x_src = jnp.dot(ft_src, wf, preferred_element_type=jnp.float32)   # (N, Dtot)
        x_dst = jnp.dot(ft_dst, wf, preferred_element_type=jnp.float32)   # (TM, Dtot)

        loop_msg = x_dst[:, :Dout]                              # (TM, Dout)
        att_dst = x_dst[:, (R + 1) * Dout:]                     # (TM, R)
        att_src_t = x_src[:, (R + 1) * Dout:].T                 # (R, N)
        x_all_bf = x_src[:, Dout:(R + 1) * Dout].astype(jnp.bfloat16)     # (N, R*Dout)

        # attention logits: s[i, j] = att[i, r] + att[j, r] with r = rel[i, j]
        s = jnp.zeros(rel.shape, jnp.float32)
        for r in range(R):
            s = jnp.where(masks[r], att_dst[:, r:r + 1] + att_src_t[r:r + 1, :], s)
        logits = jnp.where(edge, _leaky_relu(s), NEG_INF)       # f32 softmax path

        mrow = jnp.max(logits, axis=1, keepdims=True)
        p = jnp.exp(logits - mrow)                              # non-edges underflow to 0
        inv = pl.reciprocal(jnp.sum(p, axis=1, keepdims=True), approx=False)
        scale = inv * norm                                      # fold norm into softmax scale

        # masked per-relation weights precomputed -> the R MXU dots run back-to-back
        p_bf = p.astype(jnp.bfloat16)
        p_parts = [jnp.where(masks[r], p_bf, jnp.bfloat16(0)) for r in range(R)]
        acc = jnp.dot(p_parts[0], x_all_bf[:, :Dout],
                      preferred_element_type=jnp.float32)
        for r in range(1, R):
            acc = acc + jnp.dot(p_parts[r], x_all_bf[:, r * Dout:(r + 1) * Dout],
                                preferred_element_type=jnp.float32)

        node = acc * scale + loop_msg + wb                      # (TM, Dout), pre-BN
        out_ref[:, gg * Dout:(gg + 1) * Dout] = node
        stats_list.append(jnp.concatenate(
            [jnp.sum(node, axis=0, keepdims=True),
             jnp.sum(node * node, axis=0, keepdims=True)], axis=0))        # (2, Dout)

    stats_ref[...] = jnp.stack(stats_list, axis=0)[None]        # (1, G, 2, Dout)


# --------------------------- kernel 2: BatchNorm + ReLU ---------------------------
def bn_relu_kernel(x_ref, scale_ref, shift_ref, o_ref):
    o_ref[...] = jnp.maximum(x_ref[...] * scale_ref[...] + shift_ref[...], 0.0)


# ----------------------------------- wrapper --------------------------------------
def _pick_row_tile(n, target):
    """Largest TM <= target that divides n and is a multiple of 32 (int8 sublane tile)."""
    if target is None:
        target = 256
    if n <= target:
        return n
    t = (min(target, n) // 32) * 32
    while t >= 32:
        if n % t == 0:
            return t
        t -= 32
    return n


def _pick_head_group(h, dout):
    """Heads per grid step so each output block's lane width is a multiple of 128."""
    if dout % 128 == 0:
        return 1
    for g in range(1, h + 1):
        if h % g == 0 and (g * dout) % 128 == 0:
            return g
    return h   # block then equals the full last dim (legal; stores just aren't 128-dense)


def _vmem_limit_bytes():
    cap = 64 * 1024 * 1024
    try:
        info = pltpu.get_tpu_info()
        cap = int(getattr(info, "vmem_capacity_bytes", cap))
    except Exception:
        pass
    # ~100 MiB on v5e/v6e (128 MiB physical), capped with headroom under v7x's 64 MiB.
    return int(min(cap - (8 << 20), 100 << 20))


def multi_head_rgat(ft, edge_rel, norm, params, merge="cat", tm=None):
    """edge_rel: (N, N) relation id of edge (src j -> dst i) at [i, j], -1 if no edge."""
    N, Din = ft.shape
    H, R, _, Dout = params["w_rel"].shape
    Dtot = (R + 1) * Dout + R

    # Fused per-head weight slab [w_loop | w_rel_0..w_rel_{R-1} | W_r @ a_l] (bf16 MXU operand).
    # NOTE: pre-fusing W_r @ a_l changes FP summation order vs ((ft@W_r)@a_l) — fine at the
    # test tolerance, not bit-exact.
    w_all = jnp.transpose(params["w_rel"], (0, 2, 1, 3)).reshape(H, Din, R * Dout)
    w_att = jnp.einsum("hrio,ho->hir", params["w_rel"], params["att_l"][:, 0, :])
    w_fused = jnp.concatenate([params["w_loop"], w_all, w_att], axis=-1).astype(jnp.bfloat16)

    ft_bf = ft.astype(jnp.bfloat16)
    # int8 relation ids (valid while R < 128); any stray id >= R would be counted in the
    # softmax denominator but dropped from every numerator — callers must keep ids < R.
    rel_i8 = edge_rel.astype(jnp.int8)
    norm = norm.astype(jnp.float32)
    w_bias = params["w_bias"].astype(jnp.float32)

    TM = _pick_row_tile(N, tm)
    NT = N // TM
    G = _pick_head_group(H, Dout)
    HG = H // G

    vmem_limit = _vmem_limit_bytes()

    kernel = functools.partial(rgat_rows_kernel, R=R, Dout=Dout, G=G)
    node_pre, stats = pl.pallas_call(
        kernel,
        out_shape=(jax.ShapeDtypeStruct((N, H * Dout), jnp.float32),
                   jax.ShapeDtypeStruct((NT, H, 2, Dout), jnp.float32)),
        grid_spec=pltpu.PrefetchScalarGridSpec(
            num_scalar_prefetch=0,
            # row tile OUTER, heads INNER: the (TM, N) rel slab and (TM, Din) ft rows keep
            # the same block index across the head axis, so Pallas does not re-DMA them.
            grid=(NT, HG),
            in_specs=[
                pl.BlockSpec((TM, Din), lambda i, g: (i, 0)),          # ft rows (dst)
                pl.BlockSpec((N, Din), lambda i, g: (0, 0)),           # ft full (src), shared
                pl.BlockSpec((TM, N), lambda i, g: (i, 0)),            # edge_rel rows, int8
                pl.BlockSpec((TM, 1), lambda i, g: (i, 0)),            # norm rows
                pl.BlockSpec((G, Din, Dtot), lambda i, g: (g, 0, 0)),  # fused weights
                pl.BlockSpec((G, 1, Dout), lambda i, g: (g, 0, 0)),    # bias
            ],
            out_specs=[
                pl.BlockSpec((TM, G * Dout), lambda i, g: (i, g)),       # pre-BN ('cat' layout)
                pl.BlockSpec((1, G, 2, Dout), lambda i, g: (i, g, 0, 0)),  # per-tile BN stats
            ]),
        compiler_params=pltpu.CompilerParams(
            dimension_semantics=("parallel", "parallel"),
            vmem_limit_bytes=vmem_limit),
    )(ft_bf, ft_bf, rel_i8, norm, w_fused, w_bias)

    # BatchNorm finalize over ALL row tiles (tiny O(NT*H*Dout) reduction), training-mode
    # batch stats with weight=1, bias=0: fold into per-column scale/shift.
    tot = jnp.sum(stats, axis=0)                          # (H, 2, Dout)
    mean = tot[:, 0, :] / N
    var = jnp.maximum(tot[:, 1, :] / N - mean * mean, 0.0)
    inv_std = jax.lax.rsqrt(var + BN_EPS)
    scale_cols = inv_std.reshape(1, H * Dout)
    shift_cols = (-mean * inv_std).reshape(1, H * Dout)

    out = pl.pallas_call(
        bn_relu_kernel,
        out_shape=jax.ShapeDtypeStruct((N, H * Dout), jnp.float32),
        grid_spec=pltpu.PrefetchScalarGridSpec(
            num_scalar_prefetch=0,
            grid=(NT,),
            in_specs=[pl.BlockSpec((TM, H * Dout), lambda i: (i, 0)),
                      pl.BlockSpec((1, H * Dout), lambda i: (0, 0)),
                      pl.BlockSpec((1, H * Dout), lambda i: (0, 0))],
            out_specs=pl.BlockSpec((TM, H * Dout), lambda i: (i, 0))),
        compiler_params=pltpu.CompilerParams(
            dimension_semantics=("parallel",),
            vmem_limit_bytes=vmem_limit),
    )(node_pre, scale_cols, shift_cols)

    if merge == "cat":
        # torch.cat(multi_head, dim=1): head h occupies columns [h*Dout, (h+1)*Dout)
        return out
    # merge != 'cat': torch.mean(torch.stack(multi_head)) -> global scalar mean
    return jnp.mean(out)


# ----------------------------- reference (pure JAX, f32) -----------------------------
def reference_multi_head(ft, adj, rel_ids, norm, params):
    H, R, Din, Dout = params["w_rel"].shape
    N = ft.shape[0]
    relmask = jax.nn.one_hot(rel_ids, R, axis=0, dtype=jnp.float32) * adj[None]
    outs = []
    for h in range(H):
        wloop = params["w_loop"][h]
        wrel = params["w_rel"][h]
        a_l = params["att_l"][h, 0]
        wbias = params["w_bias"][h, 0]
        loop_msg = ft @ wloop
        score = jnp.zeros((N, N), jnp.float32)
        xs = []
        for r in range(R):
            x_r = ft @ wrel[r]
            a_r = (x_r @ a_l)[:, None]
            s_r = a_r + a_r.T
            score = score + relmask[r] * _leaky_relu(s_r)
            xs.append(x_r)
        logits = jnp.where(adj > 0, score, NEG_INF)
        p = jnp.exp(logits - jnp.max(logits, axis=1, keepdims=True)) * adj
        e = p / jnp.sum(p, axis=1, keepdims=True)
        accum = jnp.zeros((N, Dout), jnp.float32)
        for r in range(R):
            accum = accum + (e * relmask[r]) @ xs[r]
        node = accum * norm + wbias + loop_msg
        mean = jnp.mean(node, axis=0, keepdims=True)
        var = jnp.mean((node - mean) ** 2, axis=0, keepdims=True)
        outs.append(jnp.maximum((node - mean) * jax.lax.rsqrt(var + BN_EPS), 0.0))
    return jnp.concatenate(outs, axis=1)


# ----------------------------- parameter init -----------------------------
def xavier_uniform(key, shape, fan_in, fan_out, gain):
    bound = gain * jnp.sqrt(6.0 / (fan_in + fan_out))
    return jax.random.uniform(key, shape, jnp.float32, -bound, bound)


def init_params(key, head_num, input_dim, output_dim, rel_num, base_num):
    gain = jnp.sqrt(2.0)  # calculate_gain('relu')
    w_loop, w_rel, att_l, w_bias = [], [], [], []
    for _ in range(head_num):
        key, k1, k2, k3, k4 = jax.random.split(key, 5)
        w_loop.append(xavier_uniform(k1, (input_dim, output_dim),
                                     input_dim, output_dim, gain))
        if base_num > 0:
            w_bases = xavier_uniform(k2, (base_num, input_dim, output_dim),
                                     input_dim * output_dim,
                                     base_num * output_dim, gain)
            w_rel_coef = xavier_uniform(k3, (rel_num, base_num),
                                        base_num, rel_num, gain)
            w_rel.append(jnp.einsum("rb,bio->rio", w_rel_coef, w_bases))
        else:
            w_rel.append(xavier_uniform(k2, (rel_num, input_dim, output_dim),
                                        input_dim * output_dim,
                                        rel_num * output_dim, gain))
        att_l.append(xavier_uniform(k4, (1, output_dim), output_dim, 1, gain))
        w_bias.append(jnp.zeros((1, output_dim), jnp.float32))  # zeros_ init
    return {
        "w_loop": jnp.stack(w_loop),        # (H, Din, Dout)
        "w_rel": jnp.stack(w_rel),          # (H, R, Din, Dout)
        "att_l": jnp.stack(att_l),          # (H, 1, Dout)
        "w_bias": jnp.stack(w_bias),        # (H, 1, Dout)
    }


if __name__ == "__main__":
    # Dout multiple of 128 so each head's output block is lane-dense (G = 1).
    N, Din, Dout, R, B, H = 64, 32, 128, 4, 2, 2

    key = jax.random.PRNGKey(0)
    key, k_ft, k_adj, k_rel = jax.random.split(key, 4)

    ft = jax.random.normal(k_ft, (N, Din), jnp.float32)

    adj = (jax.random.uniform(k_adj, (N, N)) < 0.3).astype(jnp.float32)
    # guarantee every destination node has at least one incoming edge
    adj = adj.at[jnp.arange(N), (jnp.arange(N) + 1) % N].set(1.0)
    rel_ids = jax.random.randint(k_rel, (N, N), 0, R)
    # single int8 graph tensor for the kernel: relation id on edges, -1 off edges
    edge_rel = jnp.where(adj > 0, rel_ids, -1).astype(jnp.int8)
    in_deg = jnp.sum(adj, axis=1, keepdims=True)
    norm = 1.0 / in_deg                                   # typical DGL 'norm' ndata

    params = init_params(key, H, Din, Dout, R, B)

    # tm=32 -> two dst-row tiles, exercising the tiled path and cross-tile BN stats.
    out = multi_head_rgat(ft, edge_rel, norm, params, merge="cat", tm=32)
    out = jax.block_until_ready(out)

    ref = reference_multi_head(ft, adj, rel_ids, norm, params)
    assert out.shape == (N, H * Dout), out.shape
    max_err = float(jnp.max(jnp.abs(out - ref)))
    # bf16 MXU operands + (sum, sumsq) BatchNorm variance give ~1e-2 parity vs the f32
    # reference (values are O(1) post-BN), so the tolerance is 3e-2 rather than 1e-3.
    assert jnp.allclose(out, ref, atol=3e-2, rtol=3e-2), max_err

    # TODO(synk): dropout (0.0 here) and BatchNorm running-stats update are training-state
    # side effects with no Pallas-forward equivalent.
    print("KERNEL_OK")
</pallas_src>

<mosaic_0001>
module attributes {stable_mosaic.version = 11 : i64} {
  func.func @rgat_rows_kernel(%arg0: i32, %arg1: i32, %arg2: memref<32x32xbf16, #tpu.memory_space<vmem>>, %arg3: memref<64x32xbf16, #tpu.memory_space<vmem>>, %arg4: memref<32x64xi8, #tpu.memory_space<vmem>>, %arg5: memref<32x1xf32, #tpu.memory_space<vmem>>, %arg6: memref<1x32x644xbf16, #tpu.memory_space<vmem>>, %arg7: memref<1x1x128xf32, #tpu.memory_space<vmem>>, %arg8: memref<32x128xf32, #tpu.memory_space<vmem>>, %arg9: memref<1x1x2x128xf32, #tpu.memory_space<vmem>>) attributes {dimension_semantics = [#tpu.dimension_semantics<parallel>, #tpu.dimension_semantics<parallel>], iteration_bounds = array<i64: 2, 2>, scalar_prefetch = 0 : i64, scratch_operands = 0 : i64, tpu.core_type = #tpu.core_type<tc>, window_params = [{transform_indices = @transform_0, window_bounds = array<i64: 32, 32>}, {pipeline_mode = #tpu.pipeline_mode<synchronous>, transform_indices = @transform_1, window_bounds = array<i64: 64, 32>}, {transform_indices = @transform_2, window_bounds = array<i64: 32, 64>}, {transform_indices = @transform_3, window_bounds = array<i64: 32, 1>}, {transform_indices = @transform_4, window_bounds = array<i64: 1, 32, 644>}, {transform_indices = @transform_5, window_bounds = array<i64: 1, 1, 128>}, {transform_indices = @transform_6, window_bounds = array<i64: 32, 128>}, {transform_indices = @transform_7, window_bounds = array<i64: 1, 1, 2, 128>}]} {
    %c0 = arith.constant 0 : index
    %c0_0 = arith.constant 0 : index
    %0 = vector.load %arg2[%c0, %c0_0] : memref<32x32xbf16, #tpu.memory_space<vmem>>, vector<32x32xbf16>
    %c0_1 = arith.constant 0 : index
    %c0_2 = arith.constant 0 : index
    %1 = vector.load %arg3[%c0_1, %c0_2] : memref<64x32xbf16, #tpu.memory_space<vmem>>, vector<64x32xbf16>
    %c0_3 = arith.constant 0 : index
    %c0_4 = arith.constant 0 : index
    %2 = vector.load %arg4[%c0_3, %c0_4] : memref<32x64xi8, #tpu.memory_space<vmem>>, vector<32x64xi8>
    %3 = arith.extsi %2 : vector<32x64xi8> to vector<32x64xi32>
    %c0_5 = arith.constant 0 : index
    %c0_6 = arith.constant 0 : index
    %4 = vector.load %arg5[%c0_5, %c0_6] : memref<32x1xf32, #tpu.memory_space<vmem>>, vector<32x1xf32>
    %c0_i32 = arith.constant 0 : i32
    %5 = vector.broadcast %c0_i32 : i32 to vector<32x64xi32>
    %6 = arith.cmpi sge, %3, %5 : vector<32x64xi32>
    %c0_i32_7 = arith.constant 0 : i32
    %7 = vector.broadcast %c0_i32_7 : i32 to vector<32x64xi32>
    %8 = arith.cmpi eq, %3, %7 : vector<32x64xi32>
    %c1_i32 = arith.constant 1 : i32
    %9 = vector.broadcast %c1_i32 : i32 to vector<32x64xi32>
    %10 = arith.cmpi eq, %3, %9 : vector<32x64xi32>
    %c2_i32 = arith.constant 2 : i32
    %11 = vector.broadcast %c2_i32 : i32 to vector<32x64xi32>
    %12 = arith.cmpi eq, %3, %11 : vector<32x64xi32>
    %c3_i32 = arith.constant 3 : i32
    %13 = vector.broadcast %c3_i32 : i32 to vector<32x64xi32>
    %14 = arith.cmpi eq, %3, %13 : vector<32x64xi32>
    %c0_8 = arith.constant 0 : index
    %c0_9 = arith.constant 0 : index
    %c0_10 = arith.constant 0 : index
    %15 = vector.load %arg6[%c0_8, %c0_9, %c0_10] : memref<1x32x644xbf16, #tpu.memory_space<vmem>>, vector<1x32x644xbf16>
    %16 = vector.shape_cast %15 : vector<1x32x644xbf16> to vector<32x644xbf16>
    %c0_11 = arith.constant 0 : index
    %c0_12 = arith.constant 0 : index
    %c0_13 = arith.constant 0 : index
    %17 = vector.load %arg7[%c0_11, %c0_12, %c0_13] : memref<1x1x128xf32, #tpu.memory_space<vmem>>, vector<1x1x128xf32>
    %18 = vector.shape_cast %17 : vector<1x1x128xf32> to vector<1x128xf32>
    %cst = arith.constant dense<0.000000e+00> : vector<64x644xf32>
    %19 = tpu.matmul %1, %16, %cst {dimension_numbers = #tpu.dot_dimension_numbers<[1], [0], [0], [1], [0, 0, 1, 1], [], []>} : vector<64x32xbf16>, vector<32x644xbf16>, vector<64x644xf32> -> vector<64x644xf32>
    %cst_14 = arith.constant dense<0.000000e+00> : vector<32x644xf32>
    %20 = tpu.matmul %0, %16, %cst_14 {dimension_numbers = #tpu.dot_dimension_numbers<[1], [0], [0], [1], [0, 0, 1, 1], [], []>} : vector<32x32xbf16>, vector<32x644xbf16>, vector<32x644xf32> -> vector<32x644xf32>
    %21 = vector.extract_strided_slice %20 {offsets = [0, 0], sizes = [32, 128], strides = [1, 1]} : vector<32x644xf32> to vector<32x128xf32>
    %22 = vector.extract_strided_slice %20 {offsets = [0, 640], sizes = [32, 4], strides = [1, 1]} : vector<32x644xf32> to vector<32x4xf32>
    %23 = vector.extract_strided_slice %19 {offsets = [0, 640], sizes = [64, 4], strides = [1, 1]} : vector<64x644xf32> to vector<64x4xf32>
    %24 = tpu.transpose %23, [1, 0] : vector<64x4xf32> -> vector<4x64xf32>
    %25 = vector.extract_strided_slice %19 {offsets = [0, 128], sizes = [64, 512], strides = [1, 1]} : vector<64x644xf32> to vector<64x512xf32>
    %26 = arith.truncf %25 : vector<64x512xf32> to vector<64x512xbf16>
    %cst_15 = arith.constant 0.000000e+00 : f32
    %27 = vector.broadcast %cst_15 : f32 to vector<32x64xf32>
    %28 = vector.extract_strided_slice %22 {offsets = [0, 0], sizes = [32, 1], strides = [1, 1]} : vector<32x4xf32> to vector<32x1xf32>
    %29 = vector.extract_strided_slice %24 {offsets = [0, 0], sizes = [1, 64], strides = [1, 1]} : vector<4x64xf32> to vector<1x64xf32>
    %30 = vector.broadcast %28 : vector<32x1xf32> to vector<32x64xf32>
    %31 = vector.broadcast %29 : vector<1x64xf32> to vector<32x64xf32>
    %32 = arith.addf %30, %31 : vector<32x64xf32>
    %33 = arith.select %8, %32, %27 : vector<32x64xi1>, vector<32x64xf32>
    %34 = vector.extract_strided_slice %22 {offsets = [0, 1], sizes = [32, 1], strides = [1, 1]} : vector<32x4xf32> to vector<32x1xf32>
    %35 = vector.extract_strided_slice %24 {offsets = [1, 0], sizes = [1, 64], strides = [1, 1]} : vector<4x64xf32> to vector<1x64xf32>
    %36 = vector.broadcast %34 : vector<32x1xf32> to vector<32x64xf32>
    %37 = vector.broadcast %35 : vector<1x64xf32> to vector<32x64xf32>
    %38 = arith.addf %36, %37 : vector<32x64xf32>
    %39 = arith.select %10, %38, %33 : vector<32x64xi1>, vector<32x64xf32>
    %40 = vector.extract_strided_slice %22 {offsets = [0, 2], sizes = [32, 1], strides = [1, 1]} : vector<32x4xf32> to vector<32x1xf32>
    %41 = vector.extract_strided_slice %24 {offsets = [2, 0], sizes = [1, 64], strides = [1, 1]} : vector<4x64xf32> to vector<1x64xf32>
    %42 = vector.broadcast %40 : vector<32x1xf32> to vector<32x64xf32>
    %43 = vector.broadcast %41 : vector<1x64xf32> to vector<32x64xf32>
    %44 = arith.addf %42, %43 : vector<32x64xf32>
    %45 = arith.select %12, %44, %39 : vector<32x64xi1>, vector<32x64xf32>
    %46 = vector.extract_strided_slice %22 {offsets = [0, 3], sizes = [32, 1], strides = [1, 1]} : vector<32x4xf32> to vector<32x1xf32>
    %47 = vector.extract_strided_slice %24 {offsets = [3, 0], sizes = [1, 64], strides = [1, 1]} : vector<4x64xf32> to vector<1x64xf32>
    %48 = vector.broadcast %46 : vector<32x1xf32> to vector<32x64xf32>
    %49 = vector.broadcast %47 : vector<1x64xf32> to vector<32x64xf32>
    %50 = arith.addf %48, %49 : vector<32x64xf32>
    %51 = arith.select %14, %50, %45 : vector<32x64xi1>, vector<32x64xf32>
    %cst_16 = arith.constant 0.000000e+00 : f32
    %52 = vector.broadcast %cst_16 : f32 to vector<32x64xf32>
    %53 = arith.cmpf ogt, %51, %52 : vector<32x64xf32>
    %cst_17 = arith.constant 0.00999999977 : f32
    %54 = vector.broadcast %cst_17 : f32 to vector<32x64xf32>
    %55 = arith.mulf %54, %51 : vector<32x64xf32>
    %56 = arith.select %53, %51, %55 : vector<32x64xi1>, vector<32x64xf32>
    %cst_18 = arith.constant -1.000000e+30 : f32
    %57 = vector.broadcast %cst_18 : f32 to vector<32x64xf32>
    %58 = arith.select %6, %56, %57 : vector<32x64xi1>, vector<32x64xf32>
    %cst_19 = arith.constant dense<0xFF800000> : vector<32xf32>
    %59 = vector.multi_reduction <maximumf>, %58, %cst_19 [1] : vector<32x64xf32> to vector<32xf32>
    %60 = vector.shape_cast %59 : vector<32xf32> to vector<32x1xf32>
    %61 = vector.broadcast %60 : vector<32x1xf32> to vector<32x64xf32>
    %62 = arith.subf %58, %61 : vector<32x64xf32>
    %63 = math.exp %62 : vector<32x64xf32>
    %cst_20 = arith.constant dense<0.000000e+00> : vector<32xf32>
    %64 = vector.multi_reduction <add>, %63, %cst_20 [1] : vector<32x64xf32> to vector<32xf32>
    %65 = vector.shape_cast %64 : vector<32xf32> to vector<32x1xf32>
    %66 = tpu.reciprocal %65 : vector<32x1xf32> -> vector<32x1xf32>
    %67 = arith.mulf %66, %4 : vector<32x1xf32>
    %68 = arith.truncf %63 : vector<32x64xf32> to vector<32x64xbf16>
    %cst_21 = arith.constant 0.000000e+00 : bf16
    %69 = vector.broadcast %cst_21 : bf16 to vector<32x64xbf16>
    %70 = arith.select %8, %68, %69 : vector<32x64xi1>, vector<32x64xbf16>
    %cst_22 = arith.constant 0.000000e+00 : bf16
    %71 = vector.broadcast %cst_22 : bf16 to vector<32x64xbf16>
    %72 = arith.select %10, %68, %71 : vector<32x64xi1>, vector<32x64xbf16>
    %cst_23 = arith.constant 0.000000e+00 : bf16
    %73 = vector.broadcast %cst_23 : bf16 to vector<32x64xbf16>
    %74 = arith.select %12, %68, %73 : vector<32x64xi1>, vector<32x64xbf16>
    %cst_24 = arith.constant 0.000000e+00 : bf16
    %75 = vector.broadcast %cst_24 : bf16 to vector<32x64xbf16>
    %76 = arith.select %14, %68, %75 : vector<32x64xi1>, vector<32x64xbf16>
    %77 = vector.extract_strided_slice %26 {offsets = [0, 0], sizes = [64, 128], strides = [1, 1]} : vector<64x512xbf16> to vector<64x128xbf16>
    %cst_25 = arith.constant dense<0.000000e+00> : vector<32x128xf32>
    %78 = tpu.matmul %70, %77, %cst_25 {dimension_numbers = #tpu.dot_dimension_numbers<[1], [0], [0], [1], [0, 0, 1, 1], [], []>} : vector<32x64xbf16>, vector<64x128xbf16>, vector<32x128xf32> -> vector<32x128xf32>
    %79 = vector.extract_strided_slice %26 {offsets = [0, 128], sizes = [64, 128], strides = [1, 1]} : vector<64x512xbf16> to vector<64x128xbf16>
    %cst_26 = arith.constant dense<0.000000e+00> : vector<32x128xf32>
    %80 = tpu.matmul %72, %79, %cst_26 {dimension_numbers = #tpu.dot_dimension_numbers<[1], [0], [0], [1], [0, 0, 1, 1], [], []>} : vector<32x64xbf16>, vector<64x128xbf16>, vector<32x128xf32> -> vector<32x128xf32>
    %81 = arith.addf %78, %80 : vector<32x128xf32>
    %82 = vector.extract_strided_slice %26 {offsets = [0, 256], sizes = [64, 128], strides = [1, 1]} : vector<64x512xbf16> to vector<64x128xbf16>
    %cst_27 = arith.constant dense<0.000000e+00> : vector<32x128xf32>
    %83 = tpu.matmul %74, %82, %cst_27 {dimension_numbers = #tpu.dot_dimension_numbers<[1], [0], [0], [1], [0, 0, 1, 1], [], []>} : vector<32x64xbf16>, vector<64x128xbf16>, vector<32x128xf32> -> vector<32x128xf32>
    %84 = arith.addf %81, %83 : vector<32x128xf32>
    %85 = vector.extract_strided_slice %26 {offsets = [0, 384], sizes = [64, 128], strides = [1, 1]} : vector<64x512xbf16> to vector<64x128xbf16>
    %cst_28 = arith.constant dense<0.000000e+00> : vector<32x128xf32>
    %86 = tpu.matmul %76, %85, %cst_28 {dimension_numbers = #tpu.dot_dimension_numbers<[1], [0], [0], [1], [0, 0, 1, 1], [], []>} : vector<32x64xbf16>, vector<64x128xbf16>, vector<32x128xf32> -> vector<32x128xf32>
    %87 = arith.addf %84, %86 : vector<32x128xf32>
    %88 = vector.broadcast %67 : vector<32x1xf32> to vector<32x128xf32>
    %89 = arith.mulf %87, %88 : vector<32x128xf32>
    %90 = arith.addf %89, %21 : vector<32x128xf32>
    %91 = vector.broadcast %18 : vector<1x128xf32> to vector<32x128xf32>
    %92 = arith.addf %90, %91 : vector<32x128xf32>
    %c0_29 = arith.constant 0 : index
    %c0_30 = arith.constant 0 : index
    %93 = vector.load %arg8[%c0_29, %c0_30] : memref<32x128xf32, #tpu.memory_space<vmem>>, vector<32x128xf32>
    tpu.vector_store %arg8[%c0_29, %c0_30], %92 {strides = array<i32>} : memref<32x128xf32, #tpu.memory_space<vmem>>, vector<32x128xf32>,
    %cst_31 = arith.constant dense<0.000000e+00> : vector<128xf32>
    %94 = vector.multi_reduction <add>, %92, %cst_31 [0] : vector<32x128xf32> to vector<128xf32>
    %95 = vector.shape_cast %94 : vector<128xf32> to vector<1x128xf32>
    %96 = arith.mulf %92, %92 : vector<32x128xf32>
    %cst_32 = arith.constant dense<0.000000e+00> : vector<128xf32>
    %97 = vector.multi_reduction <add>, %96, %cst_32 [0] : vector<32x128xf32> to vector<128xf32>
    %98 = vector.shape_cast %97 : vector<128xf32> to vector<1x128xf32>
    %99 = tpu.concatenate %95, %98 in 0 : vector<1x128xf32>, vector<1x128xf32> -> vector<2x128xf32>
    %100 = vector.shape_cast %99 : vector<2x128xf32> to vector<1x2x128xf32>
    %101 = vector.shape_cast %100 : vector<1x2x128xf32> to vector<1x1x2x128xf32>
    %c0_33 = arith.constant 0 : index
    %c0_34 = arith.constant 0 : index
    %c0_35 = arith.constant 0 : index
    %c0_36 = arith.constant 0 : index
    %102 = vector.load %arg9[%c0_33, %c0_34, %c0_35, %c0_36] : memref<1x1x2x128xf32, #tpu.memory_space<vmem>>, vector<1x1x2x128xf32>
    tpu.vector_store %arg9[%c0_33, %c0_34, %c0_35, %c0_36], %101 {strides = array<i32>} : memref<1x1x2x128xf32, #tpu.memory_space<vmem>>, vector<1x1x2x128xf32>,
    return
  }
  func.func @transform_0(%arg0: i32, %arg1: i32) -> (i32, i32) {
    %c0_i32 = arith.constant 0 : i32
    %c0_i32_0 = arith.constant 0 : i32
    return %arg0, %c0_i32 : i32, i32
  }
  func.func @transform_1(%arg0: i32, %arg1: i32) -> (i32, i32) {
    %c0_i32 = arith.constant 0 : i32
    %c0_i32_0 = arith.constant 0 : i32
    %c0_i32_1 = arith.constant 0 : i32
    return %c0_i32, %c0_i32_0 : i32, i32
  }
  func.func @transform_2(%arg0: i32, %arg1: i32) -> (i32, i32) {
    %c0_i32 = arith.constant 0 : i32
    %c0_i32_0 = arith.constant 0 : i32
    return %arg0, %c0_i32 : i32, i32
  }
  func.func @transform_3(%arg0: i32, %arg1: i32) -> (i32, i32) {
    %c0_i32 = arith.constant 0 : i32
    %c0_i32_0 = arith.constant 0 : i32
    return %arg0, %c0_i32 : i32, i32
  }
  func.func @transform_4(%arg0: i32, %arg1: i32) -> (i32, i32, i32) {
    %c0_i32 = arith.constant 0 : i32
    %c0_i32_0 = arith.constant 0 : i32
    %c0_i32_1 = arith.constant 0 : i32
    return %arg1, %c0_i32, %c0_i32_0 : i32, i32, i32
  }
  func.func @transform_5(%arg0: i32, %arg1: i32) -> (i32, i32, i32) {
    %c0_i32 = arith.constant 0 : i32
    %c0_i32_0 = arith.constant 0 : i32
    %c0_i32_1 = arith.constant 0 : i32
    return %arg1, %c0_i32, %c0_i32_0 : i32, i32, i32
  }
  func.func @transform_6(%arg0: i32, %arg1: i32) -> (i32, i32) {
    %c0_i32 = arith.constant 0 : i32
    return %arg0, %arg1 : i32, i32
  }
  func.func @transform_7(%arg0: i32, %arg1: i32) -> (i32, i32, i32, i32) {
    %c0_i32 = arith.constant 0 : i32
    %c0_i32_0 = arith.constant 0 : i32
    %c0_i32_1 = arith.constant 0 : i32
    return %arg0, %arg1, %c0_i32, %c0_i32_0 : i32, i32, i32, i32
  }
}

</mosaic_0001>

<bundles_post_ra>
// kernel: tpu_custom_call.1
= control target key start
LH: loop header
LB: loop body
LE: loop exit
PB: predicated region body
PF: predicated region fallthrough
CT: control target
= control target key end

     0   :  { %13 = vsyncpa [#allocation3], 0  ;;  %s2612_s0 = inlined_call_operand.vmem [shape: bf16[64,32], index: 0, kind: input, shape index: {}]   ;;  %s2613_s1 = inlined_call_operand.vmem [shape: bf16[64,32], index: 1, kind: input, shape index: {}]   ;;  %s2614_s2 = inlined_call_operand.vmem [shape: s8[64,64], index: 2, kind: input, shape index: {}]   ;;  %s2615_s3 = inlined_call_operand.vmem [shape: f32[64,1], index: 3, kind: input, shape index: {}]   ;;  %s2616_s4 = inlined_call_operand.hbm [shape: bf16[2,32,644], index: 4, kind: input, shape index: {}]   ;;  %s2617_s5 = inlined_call_operand.vmem [shape: f32[2,1,128], index: 5, kind: input, shape index: {}]   ;;  %s2618_s6 = inlined_call_operand.hbm [shape: f32[64,256], index: 6, kind: output, shape index: {0}]   ;;  %s2619_s7 = inlined_call_operand.hbm [shape: f32[2,2,2,128], index: 7, kind: output, shape index: {1}]  }
   0x1   :  { %15 = vsyncpa [#allocation3 + $0x1], 0 }
   0x2   :  { %16 = vsyncpa [#allocation4], 0 }
   0x3   :  { %18 = vsyncpa [#allocation4 + $0x1], 0 }
   0x4   :  { %19 = vsyncpa [#allocation7], 0 }
   0x5   :  { %21 = vsyncpa [#allocation7 + $0x1], 0  ;;  %s2081_s24 = smov 0   ;;  %s2083_s25 = smov 0  }
   0x6   :  { %s2085_s26 = smov 0   ;;  %s2087_s27 = smov 0  }
   0x7   :  { %s2089_s28 = smov 0   ;;  %s2091_s29 = smov 0  }
   0x8   :  { %s2093_s30 = smov 0   ;;  %s2095_s8 = smov 0  }
   0x9   :  { %s2097_s9 = smov 0   ;;  %s2099_s10 = smov 0  }
   0xa   :  { %s2101_s11 = smov 0  }
   0xb LB: > { %2633 = sst [smem:[#allocation11_spill]] %s1990_s24  ;;  %s1547_s12 = sadd.s32 4294967295, %s2030_s11   ;;  %s2030_s11 = sphi %s2101_s11, %s27_s11   ;;  %s2026_s10 = sphi %s2099_s10, %s2684_s10   ;;  %s2022_s9 = sphi %s2097_s9, %s2683_s9   ;;  %s2018_s8 = sphi %s2095_s8, %s2682_s8   ;;  %s2014_s30 = sphi %s2093_s30, %s2681_s30   ;;  %s2010_s29 = sphi %s2091_s29, %s2680_s29   ;;  %s2006_s28 = sphi %s2089_s28, %s2688_s28   ;;  %s2002_s27 = sphi %s2087_s27, %s2687_s27   ;;  %s1998_s26 = sphi %s2085_s26, %s2678_s26   ;;  %s1994_s25 = sphi %s2083_s25, %s2686_s25   ;;  %s1990_s24 = sphi %s2081_s24, %s2685_s24  }
   0xc   : > { %2634 = sst [smem:[#allocation12_spill]] %s1998_s26  ;;  %s1548_s13 = sadd.s32 4294967294, %s2030_s11  }
   0xd   : > { %2635 = sst [smem:[#allocation13_spill]] %s2010_s29  ;;  %s36_s14 = sadd.s32 1, %s2022_s9 }
   0xe   : > { %2636 = sst [smem:[#allocation14_spill]] %s2022_s9  ;;  %s39_s15 = sadd.s32 1, %s2026_s10 }
   0xf   : > { %2637 = sst [smem:[#allocation15_spill]] %s2026_s10  ;;  %p37_p0 = scmp.ge.s32.totalorder %s36_s14, 2 }
  0x10   : > { %s145_s16 = sadd.s32 1, %s2010_s29  ;;  %p152_p1 = scmp.ne.s32.totalorder %s2010_s29, %s2006_s28 }
  0x11   : > { %p153_p2 = scmp.eq.s32.totalorder %s2030_s11, 0  ;;  %s2690_s14 = smov (%p37_p0, %s36_s14), 0 }
  0x12   : > { %2638 = sst [smem:[#allocation16_spill]] %s2690_s14  ;;  %s2692_s15 = smov (!%p37_p0, %s39_s15), %s2026_s10 }
  0x13   : > { %s142_s17 = ssub.s32 %s2022_s9, %s2690_s14  ;;  %p2147_p3 = por %p153_p2, %p152_p1 }
  0x14   : > { %p41_p4 = scmp.ge.s32.totalorder %s2692_s15, 2  ;;  %p143_p5 = scmp.eq.s32.totalorder %s142_s17, 0 }
  0x15   : > { %p158_p6 = scmp.ne.s32.totalorder %s2006_s28, %s2002_s27  ;;  %p159_p7 = scmp.eq.s32.totalorder %s1547_s12, 0 }
  0x16   : > { %s2694_s15 = smov (%p41_p4, %s2692_s15), 0  ;;  %s199_s23 = sadd.s32 1, %s1998_s26 }
  0x17   : > { %2640 = sst [smem:[#allocation17_spill]] %s2694_s15  ;;  %p2157_p8 = por %p159_p7, %p158_p6 }
  0x18   : > { %s2155_s19 = scalar_select %p143_p5, %s2010_s29, %s145_s16  }
  0x19   : > { %s194_s21 = ssub.s32 %s2026_s10, %s2694_s15  ;;  %p209_p10 = scmp.ne.s32.totalorder %s1998_s26, %s1994_s25 }
  0x1a   : > { %2641 = sst [smem:[#allocation18_spill]] %s2155_s19  ;;  %s196_s22 = sor.u32 %s194_s21, %s142_s17 }
  0x1b   : > { %p197_p9 = scmp.eq.s32.totalorder %s196_s22, 0  ;;  %p210_p11 = scmp.eq.s32.totalorder %s1547_s12, 3 }
  0x1c   : > { %p215_p12 = scmp.ne.s32.totalorder %s1994_s25, %s1990_s24  ;;  %p216_p0 = scmp.eq.s32.totalorder %s1548_s13, 3 }
  0x1d   : > { %s2169_s27 = scalar_select %p197_p9, %s1998_s26, %s199_s23  }
  0x1e   : > { %p2171_p13 = por %p210_p11, %p209_p10  ;;  %p1712_p1 = scmp.lt.s32.totalorder %s2030_s11, 4 }
  0x1f   : > { %2643 = sst [smem:[#allocation19_spill]] %s2169_s27  ;;  %p2176_p2 = por %p216_p0, %p215_p12 }
  0x20   : > { %s292_s17 = sand.u32 1, %s2010_s29   ;;  %s1693_s22 = smul.u32 96, %s2022_s9 }
  0x21   : > { %s1692_s21 = smul.u32 96, %s292_s17  ;;  %p1702_p4 = pnand %p1712_p1, %p2147_p3 }
  0x22   : > { %s301_s23 = scalar_lea.hbm %s2616_s4, %s1693_s22  ;;  %p1552_p5 = scmp.ge.s32.totalorder %s2030_s11, 1 }
  0x23   : > { %s296_s10 = scalar_lea.vmem [#allocation2], %s1692_s21  ;;  %s302_s27 = sshll.u32 %s301_s23, 4  ;;  %s303_s27 = int_to_ptr.hbm [resolvable:$true] %s302_s27 }
  0x24   : > { %s304_s19 = sshll.u32 %s296_s10, 4  ;;  %s293_s13 = scalar_lea.sflag [#allocation3], %s292_s17  ;;  %s305_s19 = int_to_ptr.vmem [resolvable:$true] %s304_s19 }
  0x25   : > { %s2032_s26 = smov 384   ;;  %s2033_s24 = smov 24  }
  0x26   : > { %1704 = dma.hbm_to_vmem [thread:$0]  (!%p1702_p4), %s303_s27, 1536, %s305_s19, %s293_s13, %s2032_s26, %s2032_s26, %s2033_s24  }
  0x27   : > { %p318_p6 = scmp.lt.s32.totalorder %s2030_s11, 5 }
  0x29   : > { %p319_p7 = pnand %p1552_p5, %p318_p6 }
  0x2a   : > { %s324_s18 = sand.u32 (!%p319_p7), 1, %s2006_s28  }
  0x2b   : > { %322 = sbr.rel (%p319_p7) target bundleno = 912 (0x390), region = 44  ;;  %s325_s29 = scalar_lea.sflag (!%p319_p7), [#allocation3], %s324_s18 }
  0x2c   : > { %s1694_s9 = smul.u32 (!%p319_p7), 96, %s324_s18 }
  0x2e   : > { %s2190_s15 = scalar_lea.vmem (!%p319_p7), [#allocation2], %s1694_s9 }
  0x30   : > { %1977 = dma.done.wait (%p2157_p8), %s325_s29, 1536  }
  0x31   : > { %1979 = vsyncadd (%p2157_p8), %s325_s29, 4294965760  ;;  %v1685_v0 = vld [vmem:[%s2190_s15 + $0x34] sm:$0xf]  ;;  %v1596_v1 = vld [vmem:[%s2190_s15 + $0x48] sm:$0xf0]  ;;  %vm529_vm0 = vcmask 261120  }
  0x32   : > { %v1602_v2 = vld [vmem:[%s2190_s15 + $0x38] sm:$0xf]  ;;  %v1599_v3 = vor.u32 %v1685_v0, %v1596_v1  ;;  %v1689_v4 = vld [vmem:[%s2190_s15 + $0x4c] sm:$0xf0]  ;;  %v1686_v5 = vld [vmem:[%s2190_s15 + $0x3c] sm:$0xf] }
  0x33   : > { %v1604_v6 = vld [vmem:[%s2190_s15 + $0x50] sm:$0xf0]  ;;  %v1603_v7 = vor.u32 %v1689_v4, %v1602_v2  ;;  %v1610_v9 = vld [vmem:[%s2190_s15 + $0x40] sm:$0xf]  ;;  %v1690_v10 = vld [vmem:[%s2190_s15 + $0x54] sm:$0xf0] }
  0x34   : > { %v1607_v8 = vor.u32 %v1686_v5, %v1604_v6  ;;  %v1679_v11 = vld [vmem:[%s2190_s15 + $0x4] sm:$0xf]  ;;  %548 = vmatpush.bf16.msra.mxu0 %v1599_v3  ;;  %v1611_v12 = vor.u32 %v1690_v10, %v1610_v9  ;;  %v1576_v13 = vld [vmem:[%s2190_s15 + $0x18] sm:$0xf0]  ;;  %v1582_v14 = vld [vmem:[%s2190_s15 + $0x8] sm:$0xf] }
  0x35   : > { %v1683_v15 = vld [vmem:[%s2190_s15 + $0x1c] sm:$0xf0]  ;;  %577 = vmatpush.bf16.msra.mxu1 %v1603_v7  ;;  %v1579_v16 = vor.u32 %v1679_v11, %v1576_v13  ;;  %v1680_v18 = vld [vmem:[%s2190_s15 + $0xc] sm:$0xf]  ;;  %v1584_v19 = vld [vmem:[%s2190_s15 + $0x20] sm:$0xf0] }
  0x36   : > { %606 = vmatpush.bf16.msra.mxu2 %v1607_v8  ;;  %v1583_v17 = vor.u32 %v1683_v15, %v1582_v14  ;;  %v1590_v20 = vld [vmem:[%s2190_s15 + $0x10] sm:$0xf]  ;;  %635 = vmatpush.bf16.msra.mxu3 %v1611_v12  ;;  %v1587_v21 = vor.u32 %v1680_v18, %v1584_v19  ;;  %v1684_v22 = vld [vmem:[%s2190_s15 + $0x24] sm:$0xf0]  ;;  %v1687_v23 = vld [vmem:[%s2190_s15 + $0x44] sm:$0xf] }
  0x37   : > { %v1591_v24 = vor.u32 %v1684_v22, %v1590_v20  ;;  %v1675_v25 = vld [vmem:[%s2613_s1] sm:$0xff]  ;;  %v1612_v26 = vld [vmem:[%s2190_s15 + $0x58] sm:$0xf0]  ;;  %v1681_v28 = vld [vmem:[%s2190_s15 + $0x14] sm:$0xf]  ;;  %s1555_s17 = sshll.u32 %s2018_s8, 2 }
  0x38   : > { %549 = vmatpush.bf16.msra.mxu0 %v1579_v16  ;;  %v1615_v27 = vor.u32 %v1687_v23, %v1612_v26  ;;  %v1592_v29 = vld [vmem:[%s2190_s15 + $0x28] sm:$0xf0]  ;;  %v1677_v32 = vld [vmem:[%s2613_s1 + $0x10] sm:$0xff]  ;;  %v1678_v33 = vld [vmem:[%s2613_s1 + $0x18] sm:$0xff]  ;;  %p383_p3 = scmp.lt.s32.totalorder %s1555_s17, 7  ;;  %v2034_v1 = vmov 2  }
  0x39   : > { %578 = vmatpush.bf16.msra.mxu1 %v1583_v17  ;;  %v1595_v30 = vor.u32 %v1681_v28, %v1592_v29  ;;  %v1676_v31 = vld [vmem:[%s2613_s1 + $0x8] sm:$0xff]  ;;  %v1650_v52 = vld [vmem:[%s2190_s15 + $0x30] sm:$0xf]  ;;  %v1646_v55 = vld [vmem:[%s2190_s15] sm:$0xf]  ;;  %1814 = vset.pattern.permute.xlu2 %v2034_v1  ;;  %v2035_v2 = vmov 1  }
  0x3a   : > { %607 = vmatpush.bf16.msra.mxu2 %v1587_v21  ;;  %636 = vmatpush.bf16.msra.mxu3 %v1591_v24  ;;  %s2696_s17 = smov (!%p383_p3, %s1555_s17), 7  ;;  %v1688_v53 = vld [vmem:[%s2190_s15 + $0x44] sm:$0xf0]  ;;  %v1682_v56 = vld [vmem:[%s2190_s15 + $0x14] sm:$0xf0]  ;;  %v2036_v4 = vmov 0  }
  0x3b   : > { %1616 = vmatmul.msk.bf16.vlgmr.msra.gmra.mxu0 %vm529_vm0, %v1675_v25  ;;  %s1556_s21 = sshll.u32 %s2696_s17, 2  ;;  %v1651_v54 = vor.u32 %v1688_v53, %v1650_v52  ;;  %v1647_v57 = vor.u32 %v1682_v56, %v1646_v55  ;;  %1813 = vset.pattern.permute.xlu1 %v2035_v2  ;;  %p388_p8 = scmp.lt.s32.totalorder %s2018_s8, 1  ;;  %vm917_vm15 = vcmask 523264  }
  0x3c   : > { %1620 = vmatmul.msk.bf16.vlgmr.msra.gmra.mxu1 %vm529_vm0, %v1675_v25  ;;  %664 = vmatpush.bf16.msrb.mxu0 %v1615_v27  ;;  %s386_s23 = scalar_lea.vmem %s2612_s0, %s1556_s21  ;;  %p398_p9 = scmp.lt.s32.totalorder %s2014_s30, 1 }
  0x3d   : > { %1624 = vmatmul.msk.bf16.vlgmr.msra.gmra.mxu2 %vm529_vm0, %v1675_v25  ;;  %1628 = vmatmul.msk.bf16.vlgmr.msra.gmra.mxu3 %vm529_vm0, %v1675_v25  ;;  %v1673_v34 = vld [vmem:[%s386_s23] sm:$0xff]  ;;  %v1674_v35 = vld [vmem:[%s386_s23 + $0x8] sm:$0xff]  ;;  %s389_s13 = scalar_select %p388_p8, %s2018_s8, 1 }
  0x3e   : > { %736 = vmatpush.bf16.msrb.mxu2 %v1615_v27  ;;  %717 = vmatpush.bf16.msrb.mxu1 %v1651_v54  ;;  %s2500_s29 = scalar_select %p398_p9, %s2014_s30, 1 }
  0x3f   : > { %1812 = vset.pattern.permute.xlu0 %v2036_v4  ;;  %s1557_s18 = sshll.u32 %s389_s13, 3  ;;  %s1559_s20 = sshll.u32 %s2696_s17, 3 }
  0x40   : > { %665 = vmatpush.bf16.msrb.mxu0 %v1595_v30  ;;  %s391_s26 = scalar_lea.vmem %s2614_s2, %s1557_s18  ;;  %s400_s19 = scalar_lea.vmem %s2617_s5, %s2500_s29 }
  0x41   : > { %s2513_s22 = scalar_lea.vmem %s2615_s3, %s1559_s20  ;;  %s2524_s17 = sand.u32 1, %s1994_s25  }
  0x42   : > { %737 = vmatpush.bf16.msrb.mxu2 %v1595_v30  ;;  %718 = vmatpush.bf16.msrb.mxu1 %v1647_v57  ;;  %s1553_s12 = sshll.u32 %s2524_s17, 5  ;;  %s1691_s15 = sshll.u32 %s2018_s8, 3 }
  0x43   : > { %s2532_s18 = scalar_lea.vmem [#allocation5], %s1553_s12  ;;  %s1359_s24 = sadd.s32 %s2014_s30, %s1691_s15 }
  0x44   : > { %s1669_s27 = sshll.u32 %s2018_s8, 1  ;;  %s1343_s21 = scalar_lea.sflag [#allocation4], %s2524_s17 }
  0x45   : > { %s1896_s15 = scalar_lea.hbm %s2618_s6, 128 }
  0x4b   : > { %1617 = vmatmul.msk.bf16.gmra.mxu0 %vm529_vm0, %v1676_v31 }
  0x4c   : > { %1621 = vmatmul.msk.bf16.gmra.mxu1 %vm529_vm0, %v1676_v31 }
  0x4d   : > { %1625 = vmatmul.msk.bf16.gmra.mxu2 %vm529_vm0, %v1676_v31  ;;  %1629 = vmatmul.msk.bf16.gmra.mxu3 %vm529_vm0, %v1676_v31 }
  0x5b   : > { %1618 = vmatmul.msk.bf16.gmra.mxu0 %vm529_vm0, %v1677_v32 }
  0x5c   : > { %1622 = vmatmul.msk.bf16.gmra.mxu1 %vm529_vm0, %v1677_v32 }
  0x5d   : > { %1626 = vmatmul.msk.bf16.gmra.mxu2 %vm529_vm0, %v1677_v32  ;;  %1630 = vmatmul.msk.bf16.gmra.mxu3 %vm529_vm0, %v1677_v32 }
  0x6b   : > { %1619 = vmatmul.msk.bf16.gmra.mxu0 %vm529_vm0, %v1678_v33 }
  0x6c   : > { %1623 = vmatmul.msk.bf16.gmra.mxu1 %vm529_vm0, %v1678_v33 }
  0x6d   : > { %1627 = vmatmul.msk.bf16.gmra.mxu2 %vm529_vm0, %v1678_v33  ;;  %1631 = vmatmul.msk.bf16.gmra.mxu3 %vm529_vm0, %v1678_v33 }
  0x7b   : > { %1632 = vmatmul.msk.bf16.vlgmr.msrb.gmra.mxu0 %vm529_vm0, %v1675_v25 }
  0x7c   : > { %1652 = vmatmul.msk.bf16.vlgmr.msrb.gmra.mxu1 %vm529_vm0, %v1673_v34 }
  0x7d   : > { %1654 = vmatmul.msk.bf16.vlgmr.msrb.gmra.mxu2 %vm529_vm0, %v1673_v34 }
  0x8b   : > { %1633 = vmatmul.msk.bf16.gmra.mxu0 %vm529_vm0, %v1676_v31 }
  0x8c   : > { %1653 = vmatmul.msk.bf16.gmra.mxu1 %vm529_vm0, %v1674_v35 }
  0x8d   : > { %1655 = vmatmul.msk.bf16.gmra.mxu2 %vm529_vm0, %v1674_v35 }
  0x9b   : > { %1634 = vmatmul.msk.bf16.gmra.mxu0 %vm529_vm0, %v1677_v32 }
  0xab   : > { %1635 = vmatmul.msk.bf16.gmra.mxu0 %vm529_vm0, %v1678_v33 }
  0xb8   : > { %v551_v36 = vpop.f32.mrf.mxu0 }
  0xb9   : > { %v580_v37 = vpop.f32.mrf.mxu1 }
  0xba   : > { %v2257_v38 = vpack.c.bf16 %v580_v37, %v551_v36 }
  0xc0   : > { %v609_v39 = vpop.f32.mrf.mxu2  ;;  %v638_v40 = vpop.f32.mrf.mxu3 }
  0xc1   : > { %v553_v41 = vpop.f32.mrf.mxu0  ;;  %v2259_v42 = vpack.c.bf16 %v638_v40, %v609_v39  ;;  %v582_v43 = vpop.f32.mrf.mxu1 }
  0xc2   : > { %v783_v29 = vpack.c.bf16 %v582_v43, %v553_v41 }
  0xc4   : > { %v1069_v43 = vunpack.c.h.b16 %v783_v29  ;;  %v1120_v53 = vunpack.c.l.b16 %v783_v29 }
  0xc8   : > { %v2261_v44 = vpop.f32.mrf.mxu2  ;;  %v2263_v45 = vpop.f32.mrf.mxu3 }
  0xc9   : > { %v556_v46 = vpop.f32.mrf.mxu0  ;;  %v585_v47 = vpop.f32.mrf.mxu1 }
  0xca   : > { %v785_v19 = vpack.c.bf16 %v585_v47, %v556_v46  ;;  %v1068_v47 = vunpack.c.h.b16 %v2257_v38 }
  0xcc   : > { %v1070_v30 = vunpack.c.h.b16 %v785_v19  ;;  %v1121_v31 = vunpack.c.l.b16 %v785_v19 }
  0xd0   : > { %v2265_v48 = vpop.f32.mrf.mxu2  ;;  %v2267_v49 = vpop.f32.mrf.mxu3 }
  0xd1   : > { %v558_v50 = vpop.f32.mrf.mxu0  ;;  %v587_v51 = vpop.f32.mrf.mxu1 }
  0xd2   : > { %v787_v20 = vpack.c.bf16 %v587_v51, %v558_v50  ;;  %v1119_v50 = vunpack.c.l.b16 %v2257_v38 }
  0xd4   : > { %v1071_v34 = vunpack.c.h.b16 %v787_v20  ;;  %v1122_v35 = vunpack.c.l.b16 %v787_v20 }
  0xd6   : > { %v1077_v54 = vpack.c.b16 %v1071_v34, %v1070_v30  ;;  %v1128_v55 = vpack.c.b16 %v1122_v35, %v1121_v31 }
  0xd8   : > { %v2273_v58 = vpop.f32.mrf.mxu2  ;;  %v2275_v59 = vpop.f32.mrf.mxu3 }
  0xd9   : > { %v561_v60 = vpop.f32.mrf.mxu0  ;;  %v590_v61 = vpop.f32.mrf.mxu1  ;;  %v788_v56 = vpack.c.bf16 %v2275_v59, %v2273_v58 }
  0xda   : > { %v789_v10 = vpack.c.bf16 %v590_v61, %v561_v60  ;;  %v786_v61 = vpack.c.bf16 %v2267_v49, %v2265_v48 }
  0xdc   : > { %v1072_v21 = vunpack.c.h.b16 %v789_v10  ;;  %v1123_v22 = vunpack.c.l.b16 %v789_v10  ;;  %v1180_v59 = vunpack.c.l.b16 %v786_v61 }
  0xe0   : > { %v619_v62 = vpop.f32.mrf.mxu2  ;;  %v648_v63 = vpop.f32.mrf.mxu3 }
  0xe1   : > { %v563_v0 = vpop.f32.mrf.mxu0  ;;  %v592_v3 = vpop.f32.mrf.mxu1  ;;  %v790_v51 = vpack.c.bf16 %v648_v63, %v619_v62  ;;  %v1076_v62 = vpack.c.b16 %v1069_v43, %v1068_v47  ;;  %v1127_v63 = vpack.c.b16 %v1120_v53, %v1119_v50 }
  0xe2   : > { %v791_v12 = vpack.c.bf16 %v592_v3, %v563_v0 }
  0xe3   : > { %v1182_v0 = vunpack.c.l.b16 %v790_v51  ;;  %v1237_v10 = vunpack.c.h.b16 %v790_v51 }
  0xe4   : > { %v1073_v23 = vunpack.c.h.b16 %v791_v12  ;;  %v1124_v24 = vunpack.c.l.b16 %v791_v12 }
  0xe6   : > { %v1078_v37 = vpack.c.b16 %v1073_v23, %v1072_v21  ;;  %v1129_v39 = vpack.c.b16 %v1124_v24, %v1123_v22 }
  0xe8   : > { %v621_v5 = vpop.f32.mrf.mxu2  ;;  %v650_v6 = vpop.f32.mrf.mxu3 }
  0xe9   : > { %v566_v7 = vpop.f32.mrf.mxu0  ;;  %v595_v8 = vpop.f32.mrf.mxu1  ;;  %v792_v40 = vpack.c.bf16 %v650_v6, %v621_v5  ;;  %v784_v5 = vpack.c.bf16 %v2263_v45, %v2261_v44  ;;  %v1181_v6 = vunpack.c.l.b16 %v788_v56  ;;  %v1236_v45 = vunpack.c.h.b16 %v788_v56 }
  0xea   : > { %v793_v9 = vpack.c.bf16 %v595_v8, %v566_v7 }
  0xeb   : > { %v1183_v57 = vunpack.c.l.b16 %v792_v40  ;;  %v1238_v48 = vunpack.c.h.b16 %v792_v40  ;;  %v1179_v49 = vunpack.c.l.b16 %v784_v5 }
  0xec   : > { %v1074_v16 = vunpack.c.h.b16 %v793_v9  ;;  %v1125_v17 = vunpack.c.l.b16 %v793_v9  ;;  %v1187_v9 = vpack.c.b16 %v1181_v6, %v1180_v59 }
  0xed   : > { %v1188_v58 = vpack.c.b16 %v1183_v57, %v1182_v0  ;;  %v1243_v12 = vpack.c.b16 %v1238_v48, %v1237_v10 }
  0xf0   : > { %v624_v11 = vpop.f32.mrf.mxu2  ;;  %v653_v13 = vpop.f32.mrf.mxu3 }
  0xf1   : > { %v568_v14 = vpop.f32.mrf.mxu0  ;;  %v597_v15 = vpop.f32.mrf.mxu1  ;;  %v794_v32 = vpack.c.bf16 %v653_v13, %v624_v11  ;;  %v1178_v11 = vunpack.c.l.b16 %v2259_v42 }
  0xf2   : > { %v795_v18 = vpack.c.bf16 %v597_v15, %v568_v14  ;;  %v1235_v14 = vunpack.c.h.b16 %v786_v61  ;;  %v2037_v15 = vmov 3  }
  0xf3   : > { %v1184_v52 = vunpack.c.l.b16 %v794_v32  ;;  %v1239_v7 = vunpack.c.h.b16 %v794_v32  ;;  %v1186_v13 = vpack.c.b16 %v1179_v49, %v1178_v11 }
  0xf4   : > { %v1075_v25 = vunpack.c.h.b16 %v795_v18  ;;  %v1126_v26 = vunpack.c.l.b16 %v795_v18  ;;  %v1233_v18 = vunpack.c.h.b16 %v2259_v42 }
  0xf6   : > { %v1130_v27 = vpack.c.b16 %v1126_v26, %v1125_v17  ;;  %v1079_v28 = vpack.c.b16 %v1075_v25, %v1074_v16  ;;  %v1234_v16 = vunpack.c.h.b16 %v784_v5  ;;  %v1242_v17 = vpack.c.b16 %v1236_v45, %v1235_v14 }
  0xf8   : > { %v626_v33 = vpop.f32.mrf.mxu2  ;;  %v655_v36 = vpop.f32.mrf.mxu3  ;;  %1094 = vmatpush.bf16.msrb.mxu3 %v1079_v28  ;;  %1145 = vmatpush.bf16.msra.mxu1 %v1130_v27  ;;  %v1241_v20 = vpack.c.b16 %v1234_v16, %v1233_v18 }
  0xf9   : > { %v796_v46 = vpack.c.bf16 %v655_v36, %v626_v33  ;;  %v667_v42 = vpop.f32.mrf.mxu0 }
  0xfb   : > { %v1185_v41 = vunpack.c.l.b16 %v796_v46  ;;  %v1240_v3 = vunpack.c.h.b16 %v796_v46 }
  0xfc   : > { %1095 = vmatpush.bf16.msrb.mxu3 %v1078_v37  ;;  %1146 = vmatpush.bf16.msra.mxu1 %v1129_v39  ;;  %v415_v37 = vld [vmem:[%s391_s26] sm:$0xff]  ;;  %s1668_s26 = sshll.u32 %s1359_s24, 3 }
  0xfd   : > { %v1189_v60 = vpack.c.b16 %v1185_v41, %v1184_v52  ;;  %v1244_v8 = vpack.c.b16 %v1240_v3, %v1239_v7  ;;  %v2308_v46 = vunpack.c.1.s8 %v415_v37  ;;  %v2310_v47 = vunpack.c.0.s8 %v415_v37  ;;  %s1361_s10 = scalar_lea.hbm %s2618_s6, %s1668_s26 }
  0xfe   : > { %v2312_v51 = vunpack.c.3.s8 %v415_v37  ;;  %v2315_v52 = vunpack.c.2.s8 %v415_v37  ;;  %s1364_s20 = sshll.u32 %s1361_s10, 4  ;;  %s1365_s20 = int_to_ptr.hbm [resolvable:$true] %s1364_s20 }
  0xff   : > { %1204 = vmatpush.bf16.msra.mxu2 %v1189_v60  ;;  %vm429_vm1 = vcmp.eq.s32.totalorder %v2308_v46, 0  ;;  %vm2627_vm2 = vcmp.eq.s32.totalorder %v2308_v46, 1  ;;  %vm437_vm3 = vcmp.eq.s32.totalorder %v2308_v46, 2  ;;  %vm441_vm4 = vcmp.eq.s32.totalorder %v2308_v46, 3 }
 0x100   : > { %v739_v38 = vpop.f32.mrf.mxu2  ;;  %1096 = vmatpush.bf16.msrb.mxu3 %v1077_v54  ;;  %1147 = vmatpush.bf16.msra.mxu1 %v1128_v55  ;;  %vm2628_vm5 = vcmp.eq.s32.totalorder %v2310_v47, 0  ;;  %vm2629_vm6 = vcmp.eq.s32.totalorder %v2310_v47, 1  ;;  %vm436_vm7 = vcmp.eq.s32.totalorder %v2310_v47, 2  ;;  %vm2630_vm8 = vcmp.eq.s32.totalorder %v2312_v51, 0 }
 0x101   : > { %852 = vperm.xlu2 %1814, %v739_v38   ;;  %827 = vperm.xlu1 %1813, %v739_v38   ;;  %v669_v22 = vpop.f32.mrf.mxu0  ;;  %vm439_vm11 = vcmp.eq.s32.totalorder %v2312_v51, 2  ;;  %vm2631_vm12 = vcmp.eq.s32.totalorder %v2312_v51, 3  ;;  %vm430_vm13 = vcmp.eq.s32.totalorder %v2315_v52, 0  ;;  %vm425_vm14 = vcmp.ge.s32.totalorder %v2308_v46, 0 }
 0x102   : > { %799 = vperm.xlu0 %1812, %v739_v38   ;;  %vm424_vm0 = vcmp.ge.s32.totalorder %v2310_v47, 0  ;;  %vm434_vm9 = vcmp.eq.s32.totalorder %v2315_v52, 1  ;;  %vm438_vm10 = vcmp.eq.s32.totalorder %v2315_v52, 2 }
 0x103   : > { %1205 = vmatpush.bf16.msra.mxu2 %v1188_v58 }
 0x104   : > { %1097 = vmatpush.bf16.msrb.mxu3 %v1076_v62  ;;  %1148 = vmatpush.bf16.msra.mxu1 %v1127_v63 }
 0x107   : > { %1206 = vmatpush.bf16.msra.mxu2 %v1187_v9 }
 0x108   : > { %1259 = vmatpush.bf16.msra.mxu3 %v1244_v8  ;;  %v741_v44 = vpop.f32.mrf.mxu2 }
 0x109   : > { %856 = vperm.xlu2 %1814, %v741_v44   ;;  %831 = vperm.xlu1 %1813, %v741_v44  }
 0x10a   : > { %1815 = vset.pattern.permute.xlu0 %v2037_v15 }
 0x10b   : > { %877 = vperm.xlu0 %1815, %v739_v38   ;;  %1207 = vmatpush.bf16.msra.mxu2 %v1186_v13 }
 0x10c   : > { %1260 = vmatpush.bf16.msra.mxu3 %v1243_v12 }
 0x110   : > { %1261 = vmatpush.bf16.msra.mxu3 %v1242_v17  ;;  %v744_v19 = vpop.f32.mrf.mxu2 }
 0x111   : > { %1818 = vset.pattern.permute.xlu2 %v2036_v4  ;;  %1817 = vset.pattern.permute.xlu1 %v2037_v15 }
 0x112   : > { %881 = vperm.xlu1 %1817, %v741_v44   ;;  %809 = vperm.xlu2 %1818, %v744_v19  }
 0x113   : > { %1816 = vset.pattern.permute.xlu0 %v2036_v4 }
 0x114   : > { %1262 = vmatpush.bf16.msra.mxu3 %v1241_v20  ;;  %804 = vperm.xlu0 %1816, %v741_v44  }
 0x118   : > { %v746_v21 = vpop.f32.mrf.mxu2 }
 0x11a   : > { %1820 = vset.pattern.permute.xlu1 %v2034_v1  ;;  %1819 = vset.pattern.permute.xlu2 %v2035_v2 }
 0x11b   : > { %860 = vperm.xlu1 %1820, %v744_v19   ;;  %835 = vperm.xlu2 %1819, %v744_v19  }
 0x11c   : > { %1823 = vset.pattern.permute.xlu0 %v2035_v2  ;;  %v672_v2 = vpop.f32.mrf.mxu0 }
 0x11d   : > { %839 = vperm.xlu0 %1823, %v746_v21  }
 0x123   : > { %1821 = vset.pattern.permute.xlu1 %v2036_v4  ;;  %1824 = vset.pattern.permute.xlu2 %v2034_v1 }
 0x124   : > { %814 = vperm.xlu1 %1821, %v746_v21   ;;  %864 = vperm.xlu2 %1824, %v746_v21   ;;  %v674_v23 = vpop.f32.mrf.mxu0 }
 0x12c   : > { %1822 = vset.pattern.permute.xlu1 %v2037_v15  ;;  %1825 = vset.pattern.permute.xlu2 %v2037_v15  ;;  %v677_v1 = vpop.f32.mrf.mxu0 }
 0x12d   : > { %885 = vperm.xlu1 %1822, %v744_v19   ;;  %889 = vperm.xlu2 %1825, %v746_v21  }
 0x134   : > { %v679_v24 = vpop.f32.mrf.mxu0 }
 0x135   : > { %1827 = vset.pattern.permute.xlu1 %v2036_v4  ;;  %1826 = vset.pattern.permute.xlu2 %v2036_v4 }
 0x13c   : > { %v682_v25 = vpop.f32.mrf.mxu0 }
 0x13f   : > { %749 = vxpose.xlu0.b32.start [1/8] (short) (narrow) %v667_v42, 8 }
 0x144   : > { %v684_v26 = vpop.f32.mrf.mxu0 }
 0x147   : > { %750 = vxpose.xlu0.b32.cont [2/8] (short) (narrow) %v669_v22, 8 }
 0x14f   : > { %751 = vxpose.xlu0.b32.cont [3/8] (short) (narrow) %v672_v2, 8 }
 0x157   : > { %752 = vxpose.xlu0.b32.cont [4/8] (short) (narrow) %v674_v23, 8 }
 0x15b   : > { %v853_v27 = vpop.permute.xlu2 %852 }
 0x15f   : > { %753 = vxpose.xlu0.b32.cont [5/8] (short) (narrow) %v677_v1, 8 }
 0x163   : > { %v857_v30 = vpop.permute.xlu2 %856 }
 0x167   : > { %754 = vxpose.xlu0.b32.cont [6/8] (short) (narrow) %v679_v24, 8 }
 0x16c   : > { %v810_v33 = vpop.permute.xlu2 %809 }
 0x16f   : > { %755 = vxpose.xlu0.b32.cont [7/8] (short) (narrow) %v682_v25, 8 }
 0x173   : > { %v828_v28 = vpop.permute.xlu1 %827 }
 0x174   : > { %v800_v29 = vpop.permute.xlu0 %799 }
 0x175   : > { %v836_v36 = vpop.permute.xlu2 %835 }
 0x177   : > { %756 = vxpose.xlu0.b32.end [8/8] (short) (narrow) %v684_v26, 8 }
 0x17b   : > { %v832_v31 = vpop.permute.xlu1 %831 }
 0x17d   : > { %v878_v32 = vpop.permute.xlu0 %877 }
 0x17e   : > { %v865_v50 = vpop.permute.xlu2 %864 }
 0x184   : > { %v882_v34 = vpop.permute.xlu1 %881 }
 0x186   : > { %v805_v35 = vpop.permute.xlu0 %804 }
 0x187   : > { %v890_v63 = vpop.permute.xlu2 %889 }
 0x18d   : > { %v2306_v39 = vpop.permute.xlu1 %860 }
 0x18f   : > { %v840_v40 = vpop.permute.xlu0 %839 }
 0x196   : > { %v815_v41 = vpop.permute.xlu1 %814 }
 0x19f   : > { %v886_v21 = vpop.permute.xlu1 %885 }
 0x1de   : > { %1828 = vset.pattern.permute.xlu0 %v2036_v4 }
 0x1e3   : > { %v765_v4 = vpop.trf.xlu0 }
 0x1e4   : > { %v817_v43 = vperm.slane %v765_v4, 0  ;;  %v842_v53 = vperm.slane %v765_v4, 1  ;;  %v867_v54 = vperm.slane %v765_v4, 2  ;;  %v892_v55 = vperm.slane %v765_v4, 3 }
 0x1e6   : > { %v819_v56 = vadd.f32 %v817_v43, %v805_v35  ;;  %v844_v57 = vadd.f32 %v842_v53, %v832_v31  ;;  %v869_v60 = vadd.f32 %v867_v54, %v857_v30  ;;  %v894_v61 = vadd.f32 %v892_v55, %v882_v34 }
 0x1e7   : > { %v818_v0 = vadd.f32 %v817_v43, %v800_v29  ;;  %v843_v3 = vadd.f32 %v842_v53, %v828_v28  ;;  %v868_v38 = vadd.f32 %v867_v54, %v853_v27  ;;  %v893_v62 = vadd.f32 %v892_v55, %v878_v32 }
 0x1e8   : > { %v823_v5 = vsel %vm429_vm1, %v819_v56, 0.0  ;;  %v821_v6 = vadd.f32 %v817_v43, %v815_v41  ;;  %v846_v7 = vadd.f32 %v842_v53, %v840_v40  ;;  %v871_v58 = vadd.f32 %v867_v54, %v865_v50 }
 0x1e9   : > { %v848_v59 = vsel %vm2627_vm2, %v844_v57, %v823_v5  ;;  %v822_v8 = vsel %vm2628_vm5, %v818_v0, 0.0  ;;  %v896_v48 = vadd.f32 %v892_v55, %v890_v63  ;;  %v820_v49 = vadd.f32 %v817_v43, %v810_v33 }
 0x1ea   : > { %v873_v9 = vsel %vm437_vm3, %v869_v60, %v848_v59  ;;  %v847_v10 = vsel %vm2629_vm6, %v843_v3, %v822_v8  ;;  %v825_v11 = vsel %vm2630_vm8, %v821_v6, 0.0  ;;  %v845_v44 = vadd.f32 %v842_v53, %v836_v36 }
 0x1eb   : > { %v898_v45 = vsel %vm441_vm4, %v894_v61, %v873_v9  ;;  %v872_v12 = vsel %vm436_vm7, %v868_v38, %v847_v10  ;;  %vm2646_vm2 = vcmp.eq.s32.totalorder %v2312_v51, 1  ;;  %v824_v14 = vsel %vm430_vm13, %v820_v49, 0.0 }
 0x1ec   : > { %v850_v13 = vsel %vm2646_vm2, %v846_v7, %v825_v11  ;;  %vm902_vm5 = vcmp.gt.f32.partialorder %v898_v45, 0.0  ;;  %v906_v15 = vmul.f32 0.01, %v898_v45  ;;  %vm2647_vm6 = vcmp.eq.s32.totalorder %v2310_v47, 3 }
 0x1ed   : > { %v897_v16 = vsel %vm2647_vm6, %v893_v62, %v872_v12  ;;  %v875_v17 = vsel %vm439_vm11, %v871_v58, %v850_v13  ;;  %v849_v20 = vsel %vm434_vm9, %v845_v44, %v824_v14  ;;  %vm2632_vm2 = vcmp.eq.s32.totalorder %v2315_v52, 3 }
 0x1ee   : > { %vm901_vm8 = vcmp.gt.f32.partialorder %v897_v16, 0.0  ;;  %v905_v18 = vmul.f32 0.01, %v897_v16  ;;  %v900_v19 = vsel %vm2631_vm12, %v896_v48, %v875_v17  ;;  %v910_v42 = vsel %vm902_vm5, %v898_v45, %v906_v15  ;;  %vm2424_vm12 = vmpackc.low %vm436_vm7, %vm436_vm7 }
 0x1ef   : > { %v870_v22 = vadd.f32 %v867_v54, %v2306_v39  ;;  %v914_v2 = vsel %vm425_vm14, %v910_v42, -1e+30  ;;  %v908_v1 = vmul.f32 0.01, %v900_v19  ;;  %v895_v24 = vadd.f32 %v892_v55, %v886_v21  ;;  %vm2458_vm7 = vmpackc.low %vm434_vm9, %vm434_vm9 }
 0x1f0   : > { %v909_v23 = vsel %vm901_vm8, %v897_v16, %v905_v18  ;;  %v921_v25 = vsel %vm917_vm15, %v914_v2, -inf  ;;  %vm904_vm6 = vcmp.gt.f32.partialorder %v900_v19, 0.0  ;;  %vm426_vm5 = vcmp.ge.s32.totalorder %v2315_v52, 0  ;;  %vm1020_vm9 = vmpackc.low %vm430_vm13, %vm430_vm13 }
 0x1f1   : > { %v913_v26 = vsel %vm424_vm0, %v909_v23, -1e+30  ;;  %v874_v27 = vsel %vm438_vm10, %v870_v22, %v849_v20  ;;  %922 = vmax.xlane.f32.xlu2 %v921_v25  ;;  %vm427_vm14 = vcmp.ge.s32.totalorder %v2312_v51, 0  ;;  %v912_v31 = vsel %vm904_vm6, %v900_v19, %v908_v1  ;;  %vm2381_vm0 = vmpackc.low %vm429_vm1, %vm429_vm1 }
 0x1f2   : > { %v918_v28 = vsel %vm917_vm15, %v913_v26, -inf  ;;  %v899_v29 = vsel %vm2632_vm2, %v895_v24, %v874_v27  ;;  %v916_v34 = vsel %vm427_vm14, %v912_v31, -1e+30  ;;  %vm2388_vm6 = vmpackc.low %vm437_vm3, %vm437_vm3  ;;  %vm2654_vm1 = vcmp.eq.s32.totalorder %v2310_v47, 0 }
 0x1f3   : > { %919 = vmax.xlane.f32.xlu1 %v918_v28  ;;  %vm903_vm8 = vcmp.gt.f32.partialorder %v899_v29, 0.0  ;;  %v907_v30 = vmul.f32 0.01, %v899_v29  ;;  %v927_v36 = vsel %vm917_vm15, %v916_v34, -inf  ;;  %vm2657_vm3 = vcmp.eq.s32.totalorder %v2308_v46, 1 }
 0x1f4   : > { %vm2409_vm14 = vmpackc.low %vm2657_vm3, %vm2657_vm3  ;;  %vm2665_vm3 = vcmp.eq.s32.totalorder %v2310_v47, 3  ;;  %vm2675_vm13 = vcmp.eq.s32.totalorder %v2312_v51, 3 }
 0x1f5   : > { %v911_v32 = vsel %vm903_vm8, %v899_v29, %v907_v30  ;;  %vm2402_vm8 = vmpackc.low %vm2654_vm1, %vm2654_vm1 }
 0x1f6   : > { %v915_v33 = vsel %vm426_vm5, %v911_v32, -1e+30  ;;  %vm2395_vm5 = vmpackc.low %vm441_vm4, %vm441_vm4  ;;  %vm2660_vm4 = vcmp.eq.s32.totalorder %v2310_v47, 1 }
 0x1f7   : > { %v924_v35 = vsel %vm917_vm15, %v915_v33, -inf  ;;  %vm2417_vm1 = vmpackc.low %vm2660_vm4, %vm2660_vm4 }
 0x1f8   : > { %vm2432_vm2 = vmpackc.low %vm2665_vm3, %vm2665_vm3 }
 0x1f9   : > { %925 = vmax.xlane.f32.xlu2 %v924_v35 }
 0x1fb   : > { %928 = vmax.xlane.f32.xlu1 %v927_v36 }
 0x264   : > { %v923_v37 = vpop.xlane.xlu2 %922 }
 0x265   : > { %v931_v39 = vsub.f32 %v914_v2, %v923_v37 }
 0x266   : > { %v920_v40 = vpop.xlane.xlu1 %919 }
 0x267   : > { %v930_v50 = vsub.f32 %v913_v26, %v920_v40  ;;  %v936_v4 = vmul.f32 1.442695, %v931_v39 }
 0x269   : > { %v934_v41 = vmul.f32 1.442695, %v930_v50  ;;  %1830 = vpow2.f32 %v936_v4 }
 0x26b   : > { %1832 = vpow2.f32 %v934_v41 }
 0x26c   : > { %v926_v54 = vpop.xlane.xlu2 %925 }
 0x26d   : > { %v932_v56 = vsub.f32 %v915_v33, %v926_v54 }
 0x26e   : > { %v929_v57 = vpop.xlane.xlu1 %928 }
 0x26f   : > { %v933_v61 = vsub.f32 %v916_v34, %v929_v57  ;;  %v1831_v0 = vpop.eup %1830  ;;  %v938_v3 = vmul.f32 1.442695, %v932_v56 }
 0x270   : > { %v1015_v63 = vpack.c.bf16 %v1831_v0, %v1831_v0  ;;  %v945_v6 = vsel %vm917_vm15, %v1831_v0, 0.0 }
 0x271   : > { %v1833_v62 = vpop.eup %1832  ;;  %v940_v5 = vmul.f32 1.442695, %v933_v61  ;;  %1834 = vpow2.f32 %v938_v3  ;;  %946 = vadd.xlane.f32.xlu1 %v945_v6 }
 0x272   : > { %v1014_v58 = vpack.c.bf16 %v1833_v62, %v1833_v62  ;;  %v942_v59 = vsel %vm917_vm15, %v1833_v62, 0.0  ;;  %v1031_v48 = vsel %vm2409_vm14, %v1015_v63, 0  ;;  %v1023_v49 = vsel %vm2381_vm0, %v1015_v63, 0  ;;  %vm1045_vm14 = vmpackc.low %vm2675_vm13, %vm2675_vm13 }
 0x273   : > { %1836 = vpow2.f32 %v940_v5  ;;  %943 = vadd.xlane.f32.xlu2 %v942_v59  ;;  %v1039_v9 = vsel %vm2388_vm6, %v1015_v63, 0  ;;  %v1055_v47 = vunpack.c.l.b16 %v1031_v48  ;;  %v1114_v44 = vunpack.c.l.b16 %v1023_v49 }
 0x274   : > { %v1030_v10 = vsel %vm2417_vm1, %v1014_v58, 0  ;;  %v1022_v11 = vsel %vm2402_vm8, %v1014_v58, 0  ;;  %v1038_v13 = vsel %vm2424_vm12, %v1014_v58, 0  ;;  %v1165_v14 = vunpack.c.l.b16 %v1039_v9  ;;  %vm1037_vm8 = vmpackc.low %vm439_vm11, %vm439_vm11 }
 0x275   : > { %v1054_v45 = vunpack.c.l.b16 %v1030_v10  ;;  %v1113_v12 = vunpack.c.l.b16 %v1022_v11  ;;  %v1164_v15 = vunpack.c.l.b16 %v1038_v13  ;;  %v1046_v16 = vsel %vm2432_vm2, %v1014_v58, 0  ;;  %v421_v10 = vld [vmem:[%s2513_s22 + $0x8] sm:$0xff] }
 0x276   : > { %v1047_v17 = vsel %vm2395_vm5, %v1015_v63, 0  ;;  %v1227_v20 = vunpack.c.l.b16 %v1046_v16  ;;  %vm2670_vm12 = vcmp.eq.s32.totalorder %v2312_v51, 1  ;;  %vm2673_vm0 = vcmp.eq.s32.totalorder %v2312_v51, 0  ;;  %vm1036_vm5 = vmpackc.low %vm438_vm10, %vm438_vm10 }
 0x277   : > { %v1058_v18 = vpack.c.b16 %v1055_v47, %v1054_v45  ;;  %v1117_v19 = vpack.c.b16 %v1114_v44, %v1113_v12  ;;  %v1228_v21 = vunpack.c.l.b16 %v1047_v17  ;;  %v1835_v42 = vpop.eup %1834  ;;  %v1168_v22 = vpack.c.b16 %v1165_v14, %v1164_v15  ;;  %vm2467_vm2 = vmpackc.low %vm2670_vm12, %vm2670_vm12  ;;  %v420_v44 = vld [vmem:[%s2513_s22] sm:$0xff] }
 0x278   : > { %v948_v23 = vsel %vm917_vm15, %v1835_v42, 0.0  ;;  %v1016_v27 = vpack.c.bf16 %v1835_v42, %v1835_v42  ;;  %vm1021_vm6 = vmpackc.low %vm2673_vm0, %vm2673_vm0  ;;  %vm2674_vm10 = vcmp.eq.s32.totalorder %v2315_v52, 3 }
 0x279   : > { %v1837_v2 = vpop.eup %1836  ;;  %1656 = vmatmul.msk.bf16.vlgmr.msrb.gmra.mxu3 %vm917_vm15, %v1058_v18  ;;  %1658 = vmatmul.msk.bf16.vlgmr.msra.gmra.mxu1 %vm917_vm15, %v1117_v19  ;;  %v1231_v24 = vpack.c.b16 %v1228_v21, %v1227_v20  ;;  %vm1044_vm11 = vmpackc.low %vm2674_vm10, %vm2674_vm10 }
 0x27a   : > { %1660 = vmatmul.msk.bf16.vlgmr.msra.gmra.mxu2 %vm917_vm15, %v1168_v22  ;;  %v951_v25 = vsel %vm917_vm15, %v1837_v2, 0.0  ;;  %v1017_v28 = vpack.c.bf16 %v1837_v2, %v1837_v2  ;;  %v1032_v29 = vsel %vm2458_vm7, %v1016_v27, 0  ;;  %v1024_v31 = vsel %vm1020_vm9, %v1016_v27, 0 }
 0x27b   : > { %949 = vadd.xlane.f32.xlu2 %v948_v23  ;;  %952 = vadd.xlane.f32.xlu1 %v951_v25  ;;  %v1040_v33 = vsel %vm1036_vm5, %v1016_v27, 0  ;;  %v1056_v35 = vunpack.c.l.b16 %v1032_v29  ;;  %v1115_v37 = vunpack.c.l.b16 %v1024_v31  ;;  %v1048_v53 = vsel %vm1044_vm11, %v1016_v27, 0  ;;  %v422_v27 = vld [vmem:[%s2513_s22 + $0x10] sm:$0xff]  ;;  %v423_v31 = vld [vmem:[%s2513_s22 + $0x18] sm:$0xff]  ;;  %s1890_s22 = sshra.s32 %s1365_s20, 4  ;;  %s1891_s22 = int_to_ptr.hbm [resolvable:$true] %s1890_s22 }
 0x27c   : > { %v1033_v30 = vsel %vm2467_vm2, %v1017_v28, 0  ;;  %v1025_v32 = vsel %vm1021_vm6, %v1017_v28, 0  ;;  %v1041_v34 = vsel %vm1037_vm8, %v1017_v28, 0  ;;  %v1166_v40 = vunpack.c.l.b16 %v1040_v33  ;;  %s1892_s12 = scalar_lea.hbm %s1891_s22, 32  ;;  %p1897_p0 = scmp.lt.s32.totalorder %s1891_s22, %s2618_s6 }
 0x27d   : > { %v1057_v36 = vunpack.c.l.b16 %v1033_v30  ;;  %v1116_v39 = vunpack.c.l.b16 %v1025_v32  ;;  %v1167_v50 = vunpack.c.l.b16 %v1041_v34  ;;  %v1049_v54 = vsel %vm1045_vm14, %v1017_v28, 0  ;;  %p1893_p10 = scmp.ne.s32.totalorder %s1891_s22, %s1892_s12  ;;  %p1898_p1 = scmp.lt.s32.totalorder %s1896_s15, %s1892_s12 }
 0x27e   : > { %v1229_v55 = vunpack.c.l.b16 %v1048_v53  ;;  %v1230_v56 = vunpack.c.l.b16 %v1049_v54 }
 0x27f   : > { %v1059_v4 = vpack.c.b16 %v1057_v36, %v1056_v35  ;;  %v1118_v41 = vpack.c.b16 %v1116_v39, %v1115_v37  ;;  %v1169_v43 = vpack.c.b16 %v1167_v50, %v1166_v40  ;;  %v720_v37 = vpop.f32.mrf.mxu1  ;;  %p1894_p11 = pnand %p1893_p10, %p2171_p13  ;;  %p1899_p4 = por %p1898_p1, %p1897_p0 }
 0x280   : > { %v1232_v57 = vpack.c.b16 %v1230_v56, %v1229_v55 }
 0x281   : > { %p1895_p12 = pneg %p1894_p11 }
 0x283   : > { %p1900_p5 = pnand %p1899_p4, %p1895_p12 }
 0x287   : > { %v722_v40 = vpop.f32.mrf.mxu1 }
 0x289   : > { %1657 = vmatmul.msk.bf16.gmra.mxu3 %vm917_vm15, %v1059_v4  ;;  %1659 = vmatmul.msk.bf16.gmra.mxu1 %vm917_vm15, %v1118_v41 }
 0x28a   : > { %1661 = vmatmul.msk.bf16.gmra.mxu2 %vm917_vm15, %v1169_v43 }
 0x28f   : > { %v725_v4 = vpop.f32.mrf.mxu1 }
 0x297   : > { %v727_v43 = vpop.f32.mrf.mxu1 }
 0x299   : > { %1662 = vmatmul.msk.bf16.vlgmr.msra.gmra.mxu3 %vm917_vm15, %v1231_v24 }
 0x2a9   : > { %1663 = vmatmul.msk.bf16.gmra.mxu3 %vm917_vm15, %v1232_v57 }
 0x2e4   : > { %v947_v52 = vpop.xlane.xlu1 %946 }
 0x2e5   : > { %1838 = vrcp.f32 %v947_v52  ;;  %v979_v6 = vand.u32 2147483648, %v947_v52  ;;  %v977_v58 = vand.u32 2147483647, %v947_v52  ;;  %vm973_vm1 = vweird.f32 %v947_v52 }
 0x2e6   : > { %v944_v51 = vpop.xlane.xlu2 %943 }
 0x2e7   : > { %1840 = vrcp.f32 %v944_v51  ;;  %v965_v7 = vand.u32 2147483648, %v944_v51  ;;  %v963_v8 = vand.u32 2147483647, %v944_v51  ;;  %vm959_vm3 = vweird.f32 %v944_v51 }
 0x2e8   : > { %v980_v49 = vor.u32 1.1754944e-38, %v979_v6  ;;  %vm978_vm2 = vcmp.eq.f32.partialorder %v977_v58, 8.507059e+37 }
 0x2e9   : > { %v966_v11 = vor.u32 1.1754944e-38, %v965_v7  ;;  %vm964_vm9 = vcmp.eq.f32.partialorder %v963_v8, 8.507059e+37 }
 0x2eb   : > { %v1839_v60 = vpop.eup %1838 }
 0x2ec   : > { %v969_v0 = vmul.f32 %v1839_v60, %v947_v52  ;;  %vm974_vm15 = vweird.f32 %v1839_v60 }
 0x2ed   : > { %v1841_v61 = vpop.eup %1840  ;;  %vm975_vm7 = vmor %vm973_vm1, %vm974_vm15 }
 0x2ee   : > { %v955_v3 = vmul.f32 %v1841_v61, %v944_v51  ;;  %v950_v38 = vpop.xlane.xlu2 %949  ;;  %v2506_v62 = vpop.xlane.xlu1 %952  ;;  %v970_v63 = vsub.f32 1.0, %v969_v0  ;;  %vm960_vm4 = vweird.f32 %v1841_v61 }
 0x2ef   : > { %1842 = vrcp.f32 %v950_v38  ;;  %vm961_vm12 = vmor %vm959_vm3, %vm960_vm4  ;;  %v993_v21 = vand.u32 2147483648, %v950_v38  ;;  %v1007_v2 = vand.u32 2147483648, %v2506_v62  ;;  %v991_v23 = vand.u32 2147483647, %v950_v38 }
 0x2f0   : > { %v956_v5 = vsub.f32 1.0, %v955_v3  ;;  %1844 = vrcp.f32 %v2506_v62  ;;  %v971_v46 = vmul.f32 %v1839_v60, %v970_v63  ;;  %v1005_v24 = vand.u32 2147483647, %v2506_v62  ;;  %v1829_v63 = vld [vmem:[%s400_s19] ss:$0 sm:$0xff]  ;;  %s1362_s19 = sshll.u32 %s2532_s18, 4  ;;  %s2543_s19 = int_to_ptr.vmem [resolvable:$true] %s1362_s19 }
 0x2f1   : > { %vm987_vm5 = vweird.f32 %v950_v38  ;;  %v994_v26 = vor.u32 1.1754944e-38, %v993_v21  ;;  %vm1001_vm8 = vweird.f32 %v2506_v62  ;;  %v1008_v29 = vor.u32 1.1754944e-38, %v1007_v2 }
 0x2f2   : > { %v957_v59 = vmul.f32 %v1841_v61, %v956_v5  ;;  %v972_v48 = vadd.f32 %v1839_v60, %v971_v46  ;;  %vm992_vm11 = vcmp.eq.f32.partialorder %v991_v23, 8.507059e+37  ;;  %vm1006_vm14 = vcmp.eq.f32.partialorder %v1005_v24, 8.507059e+37 }
 0x2f4   : > { %v958_v9 = vadd.f32 %v1841_v61, %v957_v59  ;;  %v976_v45 = vsel %vm975_vm7, %v1839_v60, %v972_v48 }
 0x2f5   : > { %v1843_v47 = vpop.eup %1842  ;;  %v981_v15 = vsel %vm978_vm2, %v980_v49, %v976_v45 }
 0x2f6   : > { %v1845_v12 = vpop.eup %1844  ;;  %v983_v13 = vmul.f32 %v1843_v47, %v950_v38  ;;  %v962_v14 = vsel %vm961_vm12, %v1841_v61, %v958_v9  ;;  %v1011_v18 = vmul.f32 %v981_v15, %v421_v10  ;;  %vm988_vm0 = vweird.f32 %v1843_v47  ;;  %v1150_v54 = vpop.f32.mrf.mxu1 }
 0x2f7   : > { %v997_v16 = vmul.f32 %v1845_v12, %v2506_v62  ;;  %v967_v17 = vsel %vm964_vm9, %v966_v11, %v962_v14  ;;  %vm1002_vm6 = vweird.f32 %v1845_v12  ;;  %vm989_vm10 = vmor %vm987_vm5, %vm988_vm0 }
 0x2f8   : > { %v984_v19 = vsub.f32 1.0, %v983_v13  ;;  %v1010_v20 = vmul.f32 %v967_v17, %v420_v44  ;;  %1285 = vperm.xlu1 %1827, %v1011_v18   ;;  %vm1003_vm13 = vmor %vm1001_vm8, %vm1002_vm6 }
 0x2f9   : > { %v998_v42 = vsub.f32 1.0, %v997_v16 }
 0x2fa   : > { %v985_v22 = vmul.f32 %v1843_v47, %v984_v19  ;;  %1280 = vperm.xlu2 %1826, %v1010_v20  }
 0x2fb   : > { %v999_v1 = vmul.f32 %v1845_v12, %v998_v42 }
 0x2fc   : > { %v986_v25 = vadd.f32 %v1843_v47, %v985_v22  ;;  %v1099_v39 = vpop.f32.mrf.mxu3 }
 0x2fd   : > { %v1000_v28 = vadd.f32 %v1845_v12, %v999_v1  ;;  %v1209_v55 = vpop.f32.mrf.mxu2  ;;  %v1151_v52 = vadd.f32 %v1150_v54, %v1099_v39 }
 0x2fe   : > { %v990_v30 = vsel %vm989_vm10, %v1843_v47, %v986_v25  ;;  %v1152_v57 = vpop.f32.mrf.mxu1 }
 0x2ff   : > { %v995_v32 = vsel %vm992_vm11, %v994_v26, %v990_v30  ;;  %v1004_v33 = vsel %vm1003_vm13, %v1845_v12, %v1000_v28  ;;  %v1219_v61 = vadd.f32 %v1209_v55, %v1151_v52 }
 0x300   : > { %v1012_v34 = vmul.f32 %v995_v32, %v422_v27  ;;  %v1009_v35 = vsel %vm1006_vm14, %v1008_v29, %v1004_v33 }
 0x301   : > { %v1013_v36 = vmul.f32 %v1009_v35, %v423_v31 }
 0x302   : > { %1290 = vperm.xlu2 %1826, %v1012_v34  }
 0x303   : > { %1295 = vperm.xlu0 %1828, %v1013_v36  }
 0x304   : > { %v1101_v50 = vpop.f32.mrf.mxu3 }
 0x305   : > { %v1211_v51 = vpop.f32.mrf.mxu2  ;;  %v1153_v47 = vadd.f32 %v1152_v57, %v1101_v50 }
 0x306   : > { %v1155_v3 = vpop.f32.mrf.mxu1 }
 0x307   : > { %v1220_v11 = vadd.f32 %v1211_v51, %v1153_v47 }
 0x30c   : > { %v1104_v41 = vpop.f32.mrf.mxu3 }
 0x30d   : > { %v1156_v62 = vadd.f32 %v1155_v3, %v1104_v41  ;;  %v1214_v7 = vpop.f32.mrf.mxu2 }
 0x30e   : > { %v1157_v13 = vpop.f32.mrf.mxu1 }
 0x30f   : > { %v1221_v58 = vadd.f32 %v1214_v7, %v1156_v62 }
 0x314   : > { %v1106_v53 = vpop.f32.mrf.mxu3 }
 0x315   : > { %v1158_v14 = vadd.f32 %v1157_v13, %v1106_v53  ;;  %v1216_v17 = vpop.f32.mrf.mxu2 }
 0x317   : > { %v1222_v19 = vadd.f32 %v1216_v17, %v1158_v14 }
 0x31c   : > { %v1264_v56 = vpop.f32.mrf.mxu3 }
 0x31d   : > { %v1274_v0 = vadd.f32 %v1264_v56, %v1219_v61 }
 0x324   : > { %v1266_v60 = vpop.f32.mrf.mxu3 }
 0x325   : > { %v1275_v44 = vadd.f32 %v1266_v60, %v1220_v11 }
 0x32c   : > { %v1269_v46 = vpop.f32.mrf.mxu3 }
 0x32d   : > { %v1276_v8 = vadd.f32 %v1269_v46, %v1221_v58 }
 0x334   : > { %v1271_v18 = vpop.f32.mrf.mxu3 }
 0x335   : > { %v1277_v20 = vadd.f32 %v1271_v18, %v1222_v19 }
 0x354   : > { %v1281_v38 = vpop.permute.xlu2 %1280 }
 0x355   : > { %v1298_v5 = vmul.f32 %v1281_v38, %v1274_v0 }
 0x357   : > { %v1302_v6 = vadd.f32 %v1298_v5, %v720_v37 }
 0x359   : > { %v1309_v59 = vadd.f32 %v1829_v63, %v1302_v6 }
 0x35b   : > { %1313 = vst [vmem:[%s2532_s18] sm:$0xff] %v1309_v59  ;;  %v1326_v22 = vmul.f32 %v1309_v59, %v1309_v59 }
 0x35c   : > { %v1291_v48 = vpop.permute.xlu2 %1290 }
 0x35d   : > { %v1300_v49 = vmul.f32 %v1291_v48, %v1276_v8 }
 0x35f   : > { %v1304_v9 = vadd.f32 %v1300_v49, %v725_v4 }
 0x361   : > { %v1311_v10 = vadd.f32 %v1829_v63, %v1304_v9 }
 0x363   : > { %1315 = vst [vmem:[%s2532_s18 + $0x10] sm:$0xff] %v1311_v10  ;;  %v1328_v25 = vmul.f32 %v1311_v10, %v1311_v10 }
 0x36a   : > { %v1286_v45 = vpop.permute.xlu1 %1285 }
 0x36b   : > { %v1299_v12 = vmul.f32 %v1286_v45, %v1275_v44 }
 0x36d   : > { %v1303_v15 = vadd.f32 %v1299_v12, %v722_v40 }
 0x36f   : > { %v1310_v16 = vadd.f32 %v1829_v63, %v1303_v15 }
 0x371   : > { %1314 = vst [vmem:[%s2532_s18 + $0x8] sm:$0xff] %v1310_v16  ;;  %v1327_v21 = vmul.f32 %v1310_v16, %v1310_v16  ;;  %v1317_v2 = vadd.f32 %v1310_v16, %v1309_v59 }
 0x373   : > { %v1330_v1 = vadd.f32 %v1327_v21, %v1326_v22  ;;  %v1318_v27 = vadd.f32 %v1317_v2, %v1311_v10 }
 0x375   : > { %v1296_v42 = vpop.permute.xlu0 %1295  ;;  %v1331_v30 = vadd.f32 %v1330_v1, %v1328_v25 }
 0x376   : > { %v1301_v23 = vmul.f32 %v1296_v42, %v1277_v20 }
 0x378   : > { %v1305_v24 = vadd.f32 %v1301_v23, %v727_v43 }
 0x37a   : > { %v1312_v26 = vadd.f32 %v1829_v63, %v1305_v24 }
 0x37c   : > { %1316 = vst [vmem:[%s2532_s18 + $0x18] sm:$0xff] %v1312_v26  ;;  %v1319_v28 = vadd.f32 %v1318_v27, %v1312_v26  ;;  %v1329_v29 = vmul.f32 %v1312_v26, %v1312_v26 }
 0x37d   : > { %1903 = shalt.err (!%p1900_p5)
}
 0x37e   : > { %s2038_s8 = smov 128   ;;  %s2039_s18 = smov 256   ;;  %v1320_v31 = vrot.slane %v1319_v28, 4  ;;  %v1332_v32 = vadd.f32 %v1331_v30, %v1329_v29  ;;  %vm1339_vm15 = vcmask 1040384  }
 0x37f   : > { %s2040_s29 = smov 8   ;;  %s1377_s9 = sadd.s32 %s2014_s30, %s1669_s27 }
 0x380   : > { %1697 = dma.vmem_to_hbm [thread:$0]  (%p2171_p13), %s2543_s19, 512, %s1365_s20, %s1343_s21, %s2038_s8, %s2039_s18, %s2040_s29   ;;  %v1321_v33 = vadd.f32 %v1320_v31, %v1319_v28  ;;  %v1333_v34 = vrot.slane %v1332_v32, 4 }
 0x381   : > { %s1554_s10 = sshll.u32 %s2524_s17, 1  ;;  %s1670_s22 = sshll.u32 %s1377_s9, 1 }
 0x382   : > { %v1322_v35 = vrot.slane %v1321_v33, 2  ;;  %v1334_v36 = vadd.f32 %v1333_v34, %v1332_v32  ;;  %s1379_s13 = scalar_lea.hbm %s2619_s7, %s1670_s22  ;;  %s381_s19 = scalar_lea.vmem [#allocation6], %s1554_s10 }
 0x383   : > { %s1381_s20 = sshll.u32 %s381_s19, 4  ;;  %s1383_s30 = sshll.u32 %s1379_s13, 4  ;;  %s1382_s20 = int_to_ptr.vmem [resolvable:$true] %s1381_s20  ;;  %s1384_s30 = int_to_ptr.hbm [resolvable:$true] %s1383_s30 }
 0x384   : > { %v1323_v37 = vadd.f32 %v1322_v35, %v1321_v33  ;;  %v1335_v39 = vrot.slane %v1334_v36, 2  ;;  %s1348_s27 = scalar_lea.sflag [#allocation7], %s2524_s17  ;;  %s1918_s21 = sshra.s32 %s1384_s30, 4  ;;  %s1919_s21 = int_to_ptr.hbm [resolvable:$true] %s1918_s21 }
 0x385   : > { %s1920_s15 = scalar_lea.hbm %s1919_s21, 2  ;;  %s1924_s8 = scalar_lea.hbm %s2619_s7, 8 }
 0x386   : > { %v1324_v40 = vrot.slane %v1323_v37, 1  ;;  %v1336_v50 = vadd.f32 %v1335_v39, %v1334_v36  ;;  %p1921_p6 = scmp.ne.s32.totalorder %s1919_s21, %s1920_s15  ;;  %p1925_p8 = scmp.lt.s32.totalorder %s1919_s21, %s2619_s7 }
 0x387   : > { %p1926_p9 = scmp.lt.s32.totalorder %s1924_s8, %s1920_s15 }
 0x388   : > { %v1337_v4 = vrot.slane %v1336_v50, 1  ;;  %v1325_v41 = vadd.f32 %v1324_v40, %v1323_v37  ;;  %p1922_p7 = pnand %p1921_p6, %p2171_p13 }
 0x389   : > { %p1927_p10 = por %p1926_p9, %p1925_p8 }
 0x38a   : > { %v1338_v43 = vadd.f32 %v1337_v4, %v1336_v50  ;;  %p1923_p3 = pneg %p1922_p7 }
 0x38c   : > { %v1340_v53 = vsel %vm1339_vm15, %v1325_v41, %v1338_v43  ;;  %p1928_p11 = pnand %p1927_p10, %p1923_p3 }
 0x38d   : > { %1341 = vst [vmem:[%s381_s19] sm:$0x3] %v1340_v53 }
 0x38e   : > { %1931 = shalt.err (!%p1928_p11)
}
 0x38f   : > { %1698 = dma.vmem_to_hbm [thread:$0]  (%p2171_p13), %s1382_s20, 32, %s1384_s30, %s1348_s27  }
 0x390 PF: > { %s2676_s17 = sld [smem:[#allocation11_spill]]  ;;  %p1713_p12 = scmp.ge.s32.totalorder %s2030_s11, 2 }
 0x392   : > { %p1706_p0 = pnand %p1713_p12, %p2176_p2 }
 0x394   : > { %p1707_p1 = pneg %p1706_p0 }
 0x396   : > { %s1395_s9 = sand.u32 1, %s2676_s17  }
 0x397   : > { %s1396_s10 = scalar_lea.sflag [#allocation4], %s1395_s9 }
 0x398   : > { %1981 = dma.done.wait (%p1707_p1), %s1396_s10, 512  }
 0x399   : > { %1983 = vsyncadd (%p1707_p1), %s1396_s10, 4294966784  ;;  %s1406_s22 = scalar_lea.sflag [#allocation7], %s1395_s9 }
 0x39a   : > { %1985 = dma.done.wait (%p1707_p1), %s1406_s22, 32  }
 0x39b   : > { %1987 = vsyncadd (%p1707_p1), %s1406_s22, 4294967264  ;;  %s27_s11 = sadd.s32 1, %s2030_s11   ;;  %s2677_s14 = sld [smem:[#allocation12_spill]] }
 0x39c   : > { %p24_p4 = scmp.ge.s32.totalorder %s27_s11, 6   ;;  %s2678_s26 = sld [smem:[#allocation19_spill]] }
 0x39d   : > { %s2679_s12 = sld [smem:[#allocation13_spill]]  ;;  %s2685_s24 = smov %s1994_s25 }
 0x39e   : > { %s2680_s29 = sld [smem:[#allocation18_spill]]  ;;  %s2687_s27 = smov %s2006_s28 }
 0x39f   : > { %s2681_s30 = sld [smem:[#allocation14_spill]]  ;;  %26 = sbr.rel (!%p24_p4) target bundleno = 11 (0xb), region = 118 }
 0x3a0   : > { %s2682_s8 = sld [smem:[#allocation15_spill]] }
 0x3a1   : > { %s2683_s9 = sld [smem:[#allocation16_spill]]  ;;  %s2686_s25 = smov %s2677_s14 }
 0x3a2   : > { %s2684_s10 = sld [smem:[#allocation17_spill]] }
 0x3a3   : > { %s2688_s28 = smov %s2679_s12 }
 0x3a4   :  { %1412 = vsyncpa [#allocation3], 1 }
 0x3a5   :  { %1414 = vsyncpa [#allocation3 + $0x1], 1 }
 0x3a6   :  { %1415 = vsyncpa [#allocation4], 1 }
 0x3a7   :  { %1417 = vsyncpa [#allocation4 + $0x1], 1 }
 0x3a8   :  { %1418 = vsyncpa [#allocation7], 1 }
 0x3a9   :  { %1420 = vsyncpa [#allocation7 + $0x1], 1 }

</bundles_post_ra>
